<compile_context>
chip_gen: v5e
topology: v5e:2x2
jax: 0.10.0
libtpu: 0.0.40
codegen_flags: <defaults>
</compile_context>

<pallas_src>
import functools

import jax
import jax.numpy as jnp
from jax.experimental import pallas as pl
from jax.experimental.pallas import tpu as pltpu

KS = (3, 4, 5)          # conv kernel heights: Conv2d(1, C, (k, emb_dim)) for k in KS
C_PAD = 128             # conv channels lane-padded 100 -> 128
E_PAD = 256             # contraction dim padded 150 -> 256 (incl. the constant-1 bias column)

# slice s = (kernel ki, tap dk) occupies lane columns [s*C_PAD, (s+1)*C_PAD) of wcat
_SLICE_OFFS = (0, 3, 7)
_N_SLICES = sum(KS)     # 12


def _round_up(x, m):
    return (x + m - 1) // m * m


def _textcnn_kernel(x_ref, wcat_ref, fc_ref, out_ref, *, TB, S, Cp):
    """Fused TextCNN + FC + softmax for one batch tile.

    x_ref    : (TB*S, E_PAD)       bf16  embedded tokens; col emb_dim == 1.0 (bias carrier)
    wcat_ref : (E_PAD, 12*Cp)      bf16  all conv taps side by side; bias folded in tap-0 rows
    fc_ref   : (8, Cp)             f32   rows 0-2: class-0 FC weights per kernel group,
                                         rows 3-5: class-1, row 6 lanes[0:2]: fc bias
    out_ref  : (TB, Cp)            f32   softmax probs in lanes 0/1 (lane-dense store)
    """
    x = x_ref[...]                                               # (TB*S, E_PAD) bf16
    acc0 = jnp.zeros((TB, Cp), jnp.float32)                      # class-0 pre-reduce accumulator
    acc1 = jnp.zeros((TB, Cp), jnp.float32)                      # class-1 pre-reduce accumulator

    for ki, (k, off) in enumerate(zip(KS, _SLICE_OFFS)):
        # One MXU dot per kernel group (lane-aligned weight slice), consumed immediately so
        # the f32 intermediate never exceeds k*Cp lanes per row.
        pk = jnp.dot(x, wcat_ref[:, off * Cp:(off + k) * Cp],
                     preferred_element_type=jnp.float32)          # (TB*S, k*Cp)
        pk = pk.reshape(TB, S, k * Cp)                            # S == 8 keeps (8,128) tiling
        nw = S - k + 1                                            # number of valid conv windows
        # Shift-and-add the per-tap slices (VPU adds, all lane slices 128-aligned).
        conv = pk[:, 0:nw, 0:Cp]                                  # tap-0 slice carries the bias
        for dk in range(1, k):
            conv = conv + pk[:, dk:dk + nw, dk * Cp:(dk + 1) * Cp]
        conv = jnp.maximum(conv, 0.0)                             # ReLU (padded lanes stay 0)
        pooled = jnp.max(conv, axis=1)                            # (TB, Cp) temporal max-pool
        # Dropout is identity in eval mode.  Accumulate per-class vectors; reduce once at end.
        acc0 = acc0 + pooled * fc_ref[ki:ki + 1, :]
        acc1 = acc1 + pooled * fc_ref[3 + ki:4 + ki, :]

    l0 = jnp.sum(acc0, axis=1, keepdims=True) + fc_ref[6:7, 0:1]  # (TB, 1) class-0 logit
    l1 = jnp.sum(acc1, axis=1, keepdims=True) + fc_ref[6:7, 1:2]  # (TB, 1) class-1 logit

    # exact 2-class softmax
    m = jnp.maximum(l0, l1)
    e0 = jnp.exp(l0 - m)
    e1 = jnp.exp(l1 - m)
    inv = 1.0 / (e0 + e1)
    lane = jax.lax.broadcasted_iota(jnp.int32, (TB, Cp), 1)
    out_ref[...] = jnp.where(lane == 0, e0 * inv,
                             jnp.where(lane == 1, e1 * inv, 0.0)).astype(out_ref.dtype)


def prepare_params(params, channel, emb_dim):
    """Build fused / lane-padded weights ONCE (hoisted out of the forward).

    Returns:
      wcat    (E_PAD, 12*C_PAD) bf16 : all (kernel, tap) conv slices side by side, channels
                                       padded 100->128, contraction padded 150->256; the conv
                                       bias sits in row `emb_dim` of each group's tap-0 slice
                                       (x carries a constant 1.0 in that column).
      fc_slab (8, C_PAD) f32         : rows 0-2 class-0 FC weights per kernel group,
                                       rows 3-5 class-1, row 6 lanes[0:2] = fc bias.
    """
    w3, b3, w4, b4, w5, b5, fcw, fcb = params
    pad_c = C_PAD - channel

    slices = []
    for w, b in ((w3, b3), (w4, b4), (w5, b5)):                      # w: (k, E, C), b: (C,)
        k = w.shape[0]
        wp = jnp.pad(w, ((0, 0), (0, E_PAD - emb_dim), (0, pad_c)))  # (k, E_PAD, Cp)
        # Fold conv bias into the tap-0 slice at row `emb_dim` so each window adds it once;
        # padded channel lanes stay 0 so ReLU / max-pool / FC of pads stay exactly 0.
        wp = wp.at[0, emb_dim, :].set(jnp.pad(b, (0, pad_c)))
        for dk in range(k):
            slices.append(wp[dk])                                    # (E_PAD, Cp)
    wcat = jnp.concatenate(slices, axis=1).astype(jnp.bfloat16)      # (E_PAD, 12*Cp)

    fcw3 = jnp.pad(fcw.reshape(2, 3, channel),
                   ((0, 0), (0, 0), (0, pad_c))).astype(jnp.float32)  # (2, 3, Cp)
    fc_slab = jnp.zeros((8, C_PAD), jnp.float32)
    fc_slab = fc_slab.at[0:3].set(fcw3[0])
    fc_slab = fc_slab.at[3:6].set(fcw3[1])
    fc_slab = fc_slab.at[6, 0:2].set(fcb.astype(jnp.float32))
    return wcat, fc_slab


def model_classifier_forward(tokens, emb_table, fused, *, block_b=None):
    """tokens: (B, S) int32 ids; emb_table: (V, E) f32; fused: output of prepare_params."""
    wcat, fc_slab = fused
    B, S = tokens.shape
    emb_dim = emb_table.shape[1]
    assert S >= max(KS), "sequence length must be >= largest conv kernel (5)"
    assert emb_dim < E_PAD, "E_PAD must leave room for the constant-1 bias column"
    # NOTE: S % 8 == 0 keeps the in-kernel (TB,S,.) reshape and tap-shift slices inside
    # (8,128) sublane tiles (S=8 here); other S are correct but may materialize copies.

    # Batch tile: target MXU M dim (TB*S) ~= 256 (full v6e/v7x tile; >=128 covers v5e),
    # but never pad a tiny batch beyond a multiple of 8.
    if block_b is None:
        block_b = _round_up(pl.cdiv(256, S), 8)
    tb = min(block_b, _round_up(B, 8))
    b_pad = _round_up(B, tb)

    # Embedding lookup (gather) as plain-JAX glue; append the constant-1 bias column and
    # zero-pad the contraction dim to 256, then cast to bf16 for the MXU.
    # TODO(synk): at large B*S, fuse the gather into the kernel via
    # PrefetchScalarGridSpec(num_scalar_prefetch=1) to avoid the extra HBM round trip.
    tokens_p = jnp.pad(tokens, ((0, b_pad - B), (0, 0))) if b_pad != B else tokens
    x = jnp.take(emb_table, tokens_p, axis=0).reshape(b_pad * S, emb_dim)
    ones = jnp.ones((b_pad * S, 1), x.dtype)
    zeros = jnp.zeros((b_pad * S, E_PAD - emb_dim - 1), x.dtype)
    x = jnp.concatenate([x, ones, zeros], axis=1).astype(jnp.bfloat16)   # (B_pad*S, E_PAD)

    kernel = functools.partial(_textcnn_kernel, TB=tb, S=S, Cp=C_PAD)
    out = pl.pallas_call(
        kernel,
        out_shape=jax.ShapeDtypeStruct((b_pad, C_PAD), jnp.float32),
        grid=(b_pad // tb,),
        in_specs=[
            # x tiles stream and double-buffer across the batch grid
            pl.BlockSpec((tb * S, E_PAD), lambda i: (i, 0)),
            # fused conv weights + FC slab: constant index_map -> DMA'd once, stay resident
            pl.BlockSpec((E_PAD, _N_SLICES * C_PAD), lambda i: (0, 0)),
            pl.BlockSpec((8, C_PAD), lambda i: (0, 0)),
        ],
        out_specs=pl.BlockSpec((tb, C_PAD), lambda i: (i, 0)),
        compiler_params=pltpu.CompilerParams(
            # v7x: shard batch tiles across both TensorCores; no-op on v5e/v6e.
            dimension_semantics=("parallel",),
            # Tiles here are < 2 MiB; raise vmem_limit_bytes only for very large block_b
            # (and cap it for v7x's 64 MiB physical VMEM).
        ),
    )(x, wcat, fc_slab)
    return out[:B, :2]


def init_params(key, emb_dim, channel):
    """Deterministic synthetic parameters matching Classifier(emb_dim, channel, 0.3).

    Conv weights are stored as (k, E, C), i.e. torch Conv2d weight (C,1,k,E) permuted.
    """
    ks = jax.random.split(key, 8)
    w3 = jax.random.normal(ks[0], (3, emb_dim, channel), jnp.float32) * 0.05
    b3 = jax.random.normal(ks[1], (channel,), jnp.float32) * 0.01
    w4 = jax.random.normal(ks[2], (4, emb_dim, channel), jnp.float32) * 0.05
    b4 = jax.random.normal(ks[3], (channel,), jnp.float32) * 0.01
    w5 = jax.random.normal(ks[4], (5, emb_dim, channel), jnp.float32) * 0.05
    b5 = jax.random.normal(ks[5], (channel,), jnp.float32) * 0.01
    fcw = jax.random.normal(ks[6], (2, 3 * channel), jnp.float32) * 0.05  # Linear.weight layout
    fcb = jax.random.normal(ks[7], (2,), jnp.float32) * 0.01
    return (w3, b3, w4, b4, w5, b5, fcw, fcb)


def reference_forward(tokens, emb_table, params):
    """Pure-JAX reference of the PyTorch forward (same bf16-rounded weights/acts as kernel)."""
    w3, b3, w4, b4, w5, b5, fcw, fcb = params
    x = jnp.take(emb_table, tokens, axis=0)
    x = x.astype(jnp.bfloat16).astype(jnp.float32)           # match kernel input rounding
    S = x.shape[1]
    hi = jax.lax.Precision.HIGHEST
    pools = []
    for w, b in ((w3, b3), (w4, b4), (w5, b5)):
        wf = w.astype(jnp.bfloat16).astype(jnp.float32)
        bf = b.astype(jnp.bfloat16).astype(jnp.float32)       # bias travels through bf16 wcat
        k = wf.shape[0]
        outs = []
        for t in range(S - k + 1):
            acc = bf
            for dk in range(k):
                acc = acc + jnp.matmul(x[:, t + dk, :], wf[dk], precision=hi)
            outs.append(jnp.maximum(acc, 0.0))
        pools.append(jnp.max(jnp.stack(outs, axis=0), axis=0))
    feat = jnp.concatenate(pools, axis=1)                     # dropout = identity (eval)
    logits = jnp.matmul(feat, fcw.T, precision=hi) + fcb
    return jax.nn.softmax(logits, axis=1)


if __name__ == "__main__":
    # Module-implied sizes: Classifier(emb_dim=150, channel=100, dropout=0.3), 2 classes.
    B, S = 2, 8
    EMB_DIM, CHANNEL = 150, 100
    VOCAB = 50

    root = jax.random.PRNGKey(0)
    k_emb, k_tok, k_par = jax.random.split(root, 3)

    emb_table = jax.random.normal(k_emb, (VOCAB, EMB_DIM), jnp.float32) * 0.1
    tokens = jax.random.randint(k_tok, (B, S), 0, VOCAB, dtype=jnp.int32)
    params = init_params(k_par, EMB_DIM, CHANNEL)

    # Fused / padded weights built ONCE (hoisted out of the per-call forward).
    fused = prepare_params(params, CHANNEL, EMB_DIM)

    fwd = jax.jit(model_classifier_forward)
    out = jax.block_until_ready(fwd(tokens, emb_table, fused))

    assert out.shape == (B, 2)
    # probabilities sum to 1 per row
    assert bool(jnp.all(jnp.abs(jnp.sum(out, axis=1) - 1.0) < 1e-5))
    # match the pure-JAX reference of the PyTorch forward
    ref = reference_forward(tokens, emb_table, params)
    assert bool(jnp.allclose(out, ref, atol=1e-3)), (out, ref)
    print("KERNEL_OK")
</pallas_src>

<mosaic_0001>
module attributes {stable_mosaic.version = 11 : i64} {
  func.func @_textcnn_kernel(%arg0: i32, %arg1: memref<64x256xbf16, #tpu.memory_space<vmem>>, %arg2: memref<256x1536xbf16, #tpu.memory_space<vmem>>, %arg3: memref<8x128xf32, #tpu.memory_space<vmem>>, %arg4: memref<8x128xf32, #tpu.memory_space<vmem>>) attributes {dimension_semantics = [#tpu.dimension_semantics<parallel>], iteration_bounds = array<i64: 1>, scalar_prefetch = 0 : i64, scratch_operands = 0 : i64, tpu.core_type = #tpu.core_type<tc>, window_params = [{transform_indices = @transform_0, window_bounds = array<i64: 64, 256>}, {pipeline_mode = #tpu.pipeline_mode<synchronous>, transform_indices = @transform_1, window_bounds = array<i64: 256, 1536>}, {pipeline_mode = #tpu.pipeline_mode<synchronous>, transform_indices = @transform_2, window_bounds = array<i64: 8, 128>}, {transform_indices = @transform_3, window_bounds = array<i64: 8, 128>}]} {
    %c0 = arith.constant 0 : index
    %c0_0 = arith.constant 0 : index
    %0 = vector.load %arg1[%c0, %c0_0] : memref<64x256xbf16, #tpu.memory_space<vmem>>, vector<64x256xbf16>
    %cst = arith.constant 0.000000e+00 : f32
    %1 = vector.broadcast %cst : f32 to vector<8x128xf32>
    %cst_1 = arith.constant 0.000000e+00 : f32
    %2 = vector.broadcast %cst_1 : f32 to vector<8x128xf32>
    %c0_2 = arith.constant 0 : index
    %c0_3 = arith.constant 0 : index
    %3 = vector.load %arg2[%c0_2, %c0_3] : memref<256x1536xbf16, #tpu.memory_space<vmem>>, vector<256x384xbf16>
    %cst_4 = arith.constant dense<0.000000e+00> : vector<64x384xf32>
    %4 = tpu.matmul %0, %3, %cst_4 {dimension_numbers = #tpu.dot_dimension_numbers<[1], [0], [0], [1], [0, 0, 1, 1], [], []>} : vector<64x256xbf16>, vector<256x384xbf16>, vector<64x384xf32> -> vector<64x384xf32>
    %5 = vector.shape_cast %4 : vector<64x384xf32> to vector<8x8x384xf32>
    %6 = vector.extract_strided_slice %5 {offsets = [0, 0, 0], sizes = [8, 6, 128], strides = [1, 1, 1]} : vector<8x8x384xf32> to vector<8x6x128xf32>
    %7 = vector.extract_strided_slice %5 {offsets = [0, 1, 128], sizes = [8, 6, 128], strides = [1, 1, 1]} : vector<8x8x384xf32> to vector<8x6x128xf32>
    %8 = arith.addf %6, %7 : vector<8x6x128xf32>
    %9 = vector.extract_strided_slice %5 {offsets = [0, 2, 256], sizes = [8, 6, 128], strides = [1, 1, 1]} : vector<8x8x384xf32> to vector<8x6x128xf32>
    %10 = arith.addf %8, %9 : vector<8x6x128xf32>
    %cst_5 = arith.constant 0.000000e+00 : f32
    %11 = vector.broadcast %cst_5 : f32 to vector<8x6x128xf32>
    %12 = arith.maximumf %10, %11 : vector<8x6x128xf32>
    %cst_6 = arith.constant dense<0xFF800000> : vector<8x128xf32>
    %13 = vector.multi_reduction <maximumf>, %12, %cst_6 [1] : vector<8x6x128xf32> to vector<8x128xf32>
    %c0_7 = arith.constant 0 : index
    %c0_8 = arith.constant 0 : index
    %14 = vector.load %arg3[%c0_7, %c0_8] : memref<8x128xf32, #tpu.memory_space<vmem>>, vector<1x128xf32>
    %15 = vector.broadcast %14 : vector<1x128xf32> to vector<8x128xf32>
    %16 = arith.mulf %13, %15 : vector<8x128xf32>
    %17 = arith.addf %1, %16 : vector<8x128xf32>
    %c3 = arith.constant 3 : index
    %c0_9 = arith.constant 0 : index
    %18 = vector.load %arg3[%c3, %c0_9] : memref<8x128xf32, #tpu.memory_space<vmem>>, vector<1x128xf32>
    %19 = vector.broadcast %18 : vector<1x128xf32> to vector<8x128xf32>
    %20 = arith.mulf %13, %19 : vector<8x128xf32>
    %21 = arith.addf %2, %20 : vector<8x128xf32>
    %c0_10 = arith.constant 0 : index
    %c384 = arith.constant 384 : index
    %22 = vector.load %arg2[%c0_10, %c384] : memref<256x1536xbf16, #tpu.memory_space<vmem>>, vector<256x512xbf16>
    %cst_11 = arith.constant dense<0.000000e+00> : vector<64x512xf32>
    %23 = tpu.matmul %0, %22, %cst_11 {dimension_numbers = #tpu.dot_dimension_numbers<[1], [0], [0], [1], [0, 0, 1, 1], [], []>} : vector<64x256xbf16>, vector<256x512xbf16>, vector<64x512xf32> -> vector<64x512xf32>
    %24 = vector.shape_cast %23 : vector<64x512xf32> to vector<8x8x512xf32>
    %25 = vector.extract_strided_slice %24 {offsets = [0, 0, 0], sizes = [8, 5, 128], strides = [1, 1, 1]} : vector<8x8x512xf32> to vector<8x5x128xf32>
    %26 = vector.extract_strided_slice %24 {offsets = [0, 1, 128], sizes = [8, 5, 128], strides = [1, 1, 1]} : vector<8x8x512xf32> to vector<8x5x128xf32>
    %27 = arith.addf %25, %26 : vector<8x5x128xf32>
    %28 = vector.extract_strided_slice %24 {offsets = [0, 2, 256], sizes = [8, 5, 128], strides = [1, 1, 1]} : vector<8x8x512xf32> to vector<8x5x128xf32>
    %29 = arith.addf %27, %28 : vector<8x5x128xf32>
    %30 = vector.extract_strided_slice %24 {offsets = [0, 3, 384], sizes = [8, 5, 128], strides = [1, 1, 1]} : vector<8x8x512xf32> to vector<8x5x128xf32>
    %31 = arith.addf %29, %30 : vector<8x5x128xf32>
    %cst_12 = arith.constant 0.000000e+00 : f32
    %32 = vector.broadcast %cst_12 : f32 to vector<8x5x128xf32>
    %33 = arith.maximumf %31, %32 : vector<8x5x128xf32>
    %cst_13 = arith.constant dense<0xFF800000> : vector<8x128xf32>
    %34 = vector.multi_reduction <maximumf>, %33, %cst_13 [1] : vector<8x5x128xf32> to vector<8x128xf32>
    %c1 = arith.constant 1 : index
    %c0_14 = arith.constant 0 : index
    %35 = vector.load %arg3[%c1, %c0_14] : memref<8x128xf32, #tpu.memory_space<vmem>>, vector<1x128xf32>
    %36 = vector.broadcast %35 : vector<1x128xf32> to vector<8x128xf32>
    %37 = arith.mulf %34, %36 : vector<8x128xf32>
    %38 = arith.addf %17, %37 : vector<8x128xf32>
    %c4 = arith.constant 4 : index
    %c0_15 = arith.constant 0 : index
    %39 = vector.load %arg3[%c4, %c0_15] : memref<8x128xf32, #tpu.memory_space<vmem>>, vector<1x128xf32>
    %40 = vector.broadcast %39 : vector<1x128xf32> to vector<8x128xf32>
    %41 = arith.mulf %34, %40 : vector<8x128xf32>
    %42 = arith.addf %21, %41 : vector<8x128xf32>
    %c0_16 = arith.constant 0 : index
    %c896 = arith.constant 896 : index
    %43 = vector.load %arg2[%c0_16, %c896] : memref<256x1536xbf16, #tpu.memory_space<vmem>>, vector<256x640xbf16>
    %cst_17 = arith.constant dense<0.000000e+00> : vector<64x640xf32>
    %44 = tpu.matmul %0, %43, %cst_17 {dimension_numbers = #tpu.dot_dimension_numbers<[1], [0], [0], [1], [0, 0, 1, 1], [], []>} : vector<64x256xbf16>, vector<256x640xbf16>, vector<64x640xf32> -> vector<64x640xf32>
    %45 = vector.shape_cast %44 : vector<64x640xf32> to vector<8x8x640xf32>
    %46 = vector.extract_strided_slice %45 {offsets = [0, 0, 0], sizes = [8, 4, 128], strides = [1, 1, 1]} : vector<8x8x640xf32> to vector<8x4x128xf32>
    %47 = vector.extract_strided_slice %45 {offsets = [0, 1, 128], sizes = [8, 4, 128], strides = [1, 1, 1]} : vector<8x8x640xf32> to vector<8x4x128xf32>
    %48 = arith.addf %46, %47 : vector<8x4x128xf32>
    %49 = vector.extract_strided_slice %45 {offsets = [0, 2, 256], sizes = [8, 4, 128], strides = [1, 1, 1]} : vector<8x8x640xf32> to vector<8x4x128xf32>
    %50 = arith.addf %48, %49 : vector<8x4x128xf32>
    %51 = vector.extract_strided_slice %45 {offsets = [0, 3, 384], sizes = [8, 4, 128], strides = [1, 1, 1]} : vector<8x8x640xf32> to vector<8x4x128xf32>
    %52 = arith.addf %50, %51 : vector<8x4x128xf32>
    %53 = vector.extract_strided_slice %45 {offsets = [0, 4, 512], sizes = [8, 4, 128], strides = [1, 1, 1]} : vector<8x8x640xf32> to vector<8x4x128xf32>
    %54 = arith.addf %52, %53 : vector<8x4x128xf32>
    %cst_18 = arith.constant 0.000000e+00 : f32
    %55 = vector.broadcast %cst_18 : f32 to vector<8x4x128xf32>
    %56 = arith.maximumf %54, %55 : vector<8x4x128xf32>
    %cst_19 = arith.constant dense<0xFF800000> : vector<8x128xf32>
    %57 = vector.multi_reduction <maximumf>, %56, %cst_19 [1] : vector<8x4x128xf32> to vector<8x128xf32>
    %c2 = arith.constant 2 : index
    %c0_20 = arith.constant 0 : index
    %58 = vector.load %arg3[%c2, %c0_20] : memref<8x128xf32, #tpu.memory_space<vmem>>, vector<1x128xf32>
    %59 = vector.broadcast %58 : vector<1x128xf32> to vector<8x128xf32>
    %60 = arith.mulf %57, %59 : vector<8x128xf32>
    %61 = arith.addf %38, %60 : vector<8x128xf32>
    %c5 = arith.constant 5 : index
    %c0_21 = arith.constant 0 : index
    %62 = vector.load %arg3[%c5, %c0_21] : memref<8x128xf32, #tpu.memory_space<vmem>>, vector<1x128xf32>
    %63 = vector.broadcast %62 : vector<1x128xf32> to vector<8x128xf32>
    %64 = arith.mulf %57, %63 : vector<8x128xf32>
    %65 = arith.addf %42, %64 : vector<8x128xf32>
    %cst_22 = arith.constant dense<0.000000e+00> : vector<8xf32>
    %66 = vector.multi_reduction <add>, %61, %cst_22 [1] : vector<8x128xf32> to vector<8xf32>
    %67 = vector.shape_cast %66 : vector<8xf32> to vector<8x1xf32>
    %c6 = arith.constant 6 : index
    %c0_23 = arith.constant 0 : index
    %68 = vector.load %arg3[%c6, %c0_23] : memref<8x128xf32, #tpu.memory_space<vmem>>, vector<1x1xf32>
    %69 = vector.broadcast %68 : vector<1x1xf32> to vector<8x1xf32>
    %70 = arith.addf %67, %69 : vector<8x1xf32>
    %cst_24 = arith.constant dense<0.000000e+00> : vector<8xf32>
    %71 = vector.multi_reduction <add>, %65, %cst_24 [1] : vector<8x128xf32> to vector<8xf32>
    %72 = vector.shape_cast %71 : vector<8xf32> to vector<8x1xf32>
    %c6_25 = arith.constant 6 : index
    %c1_26 = arith.constant 1 : index
    %73 = vector.load %arg3[%c6_25, %c1_26] : memref<8x128xf32, #tpu.memory_space<vmem>>, vector<1x1xf32>
    %74 = vector.broadcast %73 : vector<1x1xf32> to vector<8x1xf32>
    %75 = arith.addf %72, %74 : vector<8x1xf32>
    %76 = arith.maximumf %70, %75 : vector<8x1xf32>
    %77 = arith.subf %70, %76 : vector<8x1xf32>
    %78 = math.exp %77 : vector<8x1xf32>
    %79 = arith.subf %75, %76 : vector<8x1xf32>
    %80 = math.exp %79 : vector<8x1xf32>
    %81 = arith.addf %78, %80 : vector<8x1xf32>
    %cst_27 = arith.constant 1.000000e+00 : f32
    %82 = vector.broadcast %cst_27 : f32 to vector<8x1xf32>
    %83 = arith.divf %82, %81 : vector<8x1xf32>
    %84 = tpu.iota {dimensions = array<i32: 1>} : vector<8x128xi32>
    %c0_i32 = arith.constant 0 : i32
    %85 = vector.broadcast %c0_i32 : i32 to vector<8x128xi32>
    %86 = arith.cmpi eq, %84, %85 : vector<8x128xi32>
    %87 = arith.mulf %78, %83 : vector<8x1xf32>
    %c1_i32 = arith.constant 1 : i32
    %88 = vector.broadcast %c1_i32 : i32 to vector<8x128xi32>
    %89 = arith.cmpi eq, %84, %88 : vector<8x128xi32>
    %90 = arith.mulf %80, %83 : vector<8x1xf32>
    %cst_28 = arith.constant 0.000000e+00 : f32
    %91 = vector.shape_cast %90 : vector<8x1xf32> to vector<8x1xf32>
    %92 = vector.broadcast %91 : vector<8x1xf32> to vector<8x128xf32>
    %93 = vector.broadcast %cst_28 : f32 to vector<8x128xf32>
    %94 = arith.select %89, %92, %93 : vector<8x128xi1>, vector<8x128xf32>
    %95 = vector.shape_cast %87 : vector<8x1xf32> to vector<8x1xf32>
    %96 = vector.broadcast %95 : vector<8x1xf32> to vector<8x128xf32>
    %97 = arith.select %86, %96, %94 : vector<8x128xi1>, vector<8x128xf32>
    %c0_29 = arith.constant 0 : index
    %c0_30 = arith.constant 0 : index
    %98 = vector.load %arg4[%c0_29, %c0_30] : memref<8x128xf32, #tpu.memory_space<vmem>>, vector<8x128xf32>
    tpu.vector_store %arg4[%c0_29, %c0_30], %97 {strides = array<i32>} : memref<8x128xf32, #tpu.memory_space<vmem>>, vector<8x128xf32>,
    return
  }
  func.func @transform_0(%arg0: i32) -> (i32, i32) {
    %c0_i32 = arith.constant 0 : i32
    %c0_i32_0 = arith.constant 0 : i32
    return %arg0, %c0_i32 : i32, i32
  }
  func.func @transform_1(%arg0: i32) -> (i32, i32) {
    %c0_i32 = arith.constant 0 : i32
    %c0_i32_0 = arith.constant 0 : i32
    %c0_i32_1 = arith.constant 0 : i32
    return %c0_i32, %c0_i32_0 : i32, i32
  }
  func.func @transform_2(%arg0: i32) -> (i32, i32) {
    %c0_i32 = arith.constant 0 : i32
    %c0_i32_0 = arith.constant 0 : i32
    %c0_i32_1 = arith.constant 0 : i32
    return %c0_i32, %c0_i32_0 : i32, i32
  }
  func.func @transform_3(%arg0: i32) -> (i32, i32) {
    %c0_i32 = arith.constant 0 : i32
    %c0_i32_0 = arith.constant 0 : i32
    return %arg0, %c0_i32 : i32, i32
  }
}

</mosaic_0001>

<bundles_post_ra>
// kernel: model_classifier_forward.1
= control target key start
LH: loop header
LB: loop body
LE: loop exit
PB: predicated region body
PF: predicated region fallthrough
CT: control target
= control target key end

     0   :  { %8 = vsyncpa [#allocation3], 0  ;;  %s3754_s15 = smov [#allocation2]   ;;  %s3755_s17 = smov 768   ;;  %s4253_s0 = inlined_call_operand.vmem [shape: bf16[64,256], index: 0, kind: input, shape index: {}]   ;;  %s4254_s1 = inlined_call_operand.hbm [shape: bf16[256,1536], index: 1, kind: input, shape index: {}]   ;;  %s4255_s2 = inlined_call_operand.vmem [shape: f32[8,128], index: 2, kind: input, shape index: {}]   ;;  %s4256_s3 = inlined_call_operand.vmem [shape: f32[8,128], index: 3, kind: output, shape index: {}]  }
   0x1   :  { %s15_s14 = sshll.u32 %s4254_s1, 4  ;;  %s17_s16 = sshll.u32 %s3754_s15, 4  ;;  %s16_s14 = int_to_ptr.hbm [resolvable:$true] %s15_s14  ;;  %s18_s16 = int_to_ptr.vmem [resolvable:$true] %s17_s16 }
   0x2   :  { %s3756_s18 = smov 48  }
   0x3   :  { %23 = dma.hbm_to_vmem [thread:$0]  %s16_s14, 24576, %s18_s16, [#allocation3], %s3755_s17, %s3755_s17, %s3756_s18  }
   0x4   :  { %3752 = dma.done.wait [#allocation3], 24576  }
   0x5   :  { %3753 = vsyncadd [#allocation3], 4294942720  ;;  %v2823_v0 = vld [vmem:[#allocation2 + $0x2a0] sm:$0xf]  ;;  %v3535_v1 = vld [vmem:[#allocation2 + $0x2cc] sm:$0xf0] }
   0x6   :  { %v2919_v2 = vld [vmem:[#allocation2 + $0x5a0] sm:$0xf]  ;;  %v2824_v3 = vor.u32 %v3535_v1, %v2823_v0  ;;  %v3559_v4 = vld [vmem:[#allocation2 + $0x5cc] sm:$0xf0]  ;;  %v3534_v5 = vld [vmem:[#allocation2 + $0x2a4] sm:$0xf] }
   0x7   :  { %v2825_v6 = vld [vmem:[#allocation2 + $0x2d0] sm:$0xf0]  ;;  %v2920_v7 = vor.u32 %v3559_v4, %v2919_v2  ;;  %v3558_v9 = vld [vmem:[#allocation2 + $0x5a4] sm:$0xf]  ;;  %v2811_v11 = vld [vmem:[#allocation2 + $0x240] sm:$0xf] }
   0x8   :  { %v2828_v8 = vor.u32 %v3534_v5, %v2825_v6  ;;  %v2921_v10 = vld [vmem:[#allocation2 + $0x5d0] sm:$0xf0]  ;;  %398 = vmatpush.bf16.msra.mxu0 %v2824_v3  ;;  %v3532_v13 = vld [vmem:[#allocation2 + $0x26c] sm:$0xf0]  ;;  %v2907_v14 = vld [vmem:[#allocation2 + $0x540] sm:$0xf] }
   0x9   :  { %v2924_v12 = vor.u32 %v3558_v9, %v2921_v10  ;;  %v3556_v15 = vld [vmem:[#allocation2 + $0x56c] sm:$0xf0]  ;;  %427 = vmatpush.bf16.msra.mxu1 %v2920_v7  ;;  %v2812_v16 = vor.u32 %v3532_v13, %v2811_v11  ;;  %v3531_v18 = vld [vmem:[#allocation2 + $0x244] sm:$0xf]  ;;  %v2813_v19 = vld [vmem:[#allocation2 + $0x270] sm:$0xf0] }
   0xa   :  { %456 = vmatpush.bf16.msra.mxu2 %v2828_v8  ;;  %v2908_v17 = vor.u32 %v3556_v15, %v2907_v14  ;;  %v3555_v20 = vld [vmem:[#allocation2 + $0x544] sm:$0xf]  ;;  %v2816_v21 = vor.u32 %v3531_v18, %v2813_v19  ;;  %v2909_v22 = vld [vmem:[#allocation2 + $0x570] sm:$0xf0]  ;;  %v2799_v23 = vld [vmem:[#allocation2 + $0x1e0] sm:$0xf] }
   0xb   :  { %485 = vmatpush.bf16.msra.mxu3 %v2924_v12  ;;  %v3529_v24 = vld [vmem:[#allocation2 + $0x20c] sm:$0xf0]  ;;  %v2912_v25 = vor.u32 %v3555_v20, %v2909_v22  ;;  %v2895_v26 = vld [vmem:[#allocation2 + $0x4e0] sm:$0xf]  ;;  %v3528_v28 = vld [vmem:[#allocation2 + $0x1e4] sm:$0xf] }
   0xc   :  { %v3553_v27 = vld [vmem:[#allocation2 + $0x50c] sm:$0xf0]  ;;  %399 = vmatpush.bf16.msra.mxu0 %v2812_v16  ;;  %v2800_v29 = vor.u32 %v3529_v24, %v2799_v23  ;;  %v2801_v30 = vld [vmem:[#allocation2 + $0x210] sm:$0xf0]  ;;  %v3552_v31 = vld [vmem:[#allocation2 + $0x4e4] sm:$0xf] }
   0xd   :  { %v2897_v32 = vld [vmem:[#allocation2 + $0x510] sm:$0xf0]  ;;  %428 = vmatpush.bf16.msra.mxu1 %v2908_v17  ;;  %v2896_v33 = vor.u32 %v3553_v27, %v2895_v26  ;;  %v2804_v34 = vor.u32 %v3528_v28, %v2801_v30  ;;  %v2787_v35 = vld [vmem:[#allocation2 + $0x180] sm:$0xf]  ;;  %v3526_v36 = vld [vmem:[#allocation2 + $0x1ac] sm:$0xf0] }
   0xe   :  { %457 = vmatpush.bf16.msra.mxu2 %v2816_v21  ;;  %v2883_v37 = vld [vmem:[#allocation2 + $0x480] sm:$0xf]  ;;  %v2900_v38 = vor.u32 %v3552_v31, %v2897_v32  ;;  %v3550_v39 = vld [vmem:[#allocation2 + $0x4ac] sm:$0xf0]  ;;  %v3525_v40 = vld [vmem:[#allocation2 + $0x184] sm:$0xf]  ;;  %v2788_v44 = vor.u32 %v3526_v36, %v2787_v35 }
   0xf   :  { %486 = vmatpush.bf16.msra.mxu3 %v2912_v25  ;;  %v2789_v41 = vld [vmem:[#allocation2 + $0x1b0] sm:$0xf0]  ;;  %v3549_v42 = vld [vmem:[#allocation2 + $0x484] sm:$0xf]  ;;  %v2884_v45 = vor.u32 %v3550_v39, %v2883_v37  ;;  %v2775_v47 = vld [vmem:[#allocation2 + $0x120] sm:$0xf] }
  0x10   :  { %v2885_v43 = vld [vmem:[#allocation2 + $0x4b0] sm:$0xf0]  ;;  %400 = vmatpush.bf16.msra.mxu0 %v2800_v29  ;;  %v2792_v46 = vor.u32 %v3525_v40, %v2789_v41  ;;  %v3523_v48 = vld [vmem:[#allocation2 + $0x14c] sm:$0xf0]  ;;  %v2871_v49 = vld [vmem:[#allocation2 + $0x420] sm:$0xf] }
  0x11   :  { %429 = vmatpush.bf16.msra.mxu1 %v2896_v33  ;;  %v2888_v50 = vor.u32 %v3549_v42, %v2885_v43  ;;  %v3547_v51 = vld [vmem:[#allocation2 + $0x44c] sm:$0xf0]  ;;  %v3522_v52 = vld [vmem:[#allocation2 + $0x124] sm:$0xf]  ;;  %v2777_v53 = vld [vmem:[#allocation2 + $0x150] sm:$0xf0]  ;;  %v2776_v56 = vor.u32 %v3523_v48, %v2775_v47 }
  0x12   :  { %458 = vmatpush.bf16.msra.mxu2 %v2804_v34  ;;  %v3546_v54 = vld [vmem:[#allocation2 + $0x424] sm:$0xf]  ;;  %v2873_v55 = vld [vmem:[#allocation2 + $0x450] sm:$0xf0]  ;;  %v2872_v57 = vor.u32 %v3547_v51, %v2871_v49  ;;  %v2780_v58 = vor.u32 %v3522_v52, %v2777_v53  ;;  %v2763_v59 = vld [vmem:[#allocation2 + $0xc0] sm:$0xf] }
  0x13   :  { %487 = vmatpush.bf16.msra.mxu3 %v2900_v38  ;;  %v3520_v60 = vld [vmem:[#allocation2 + $0xec] sm:$0xf0]  ;;  %v2859_v61 = vld [vmem:[#allocation2 + $0x3c0] sm:$0xf]  ;;  %v2876_v62 = vor.u32 %v3546_v54, %v2873_v55  ;;  %v3519_v0 = vld [vmem:[#allocation2 + $0xc4] sm:$0xf] }
  0x14   :  { %401 = vmatpush.bf16.msra.mxu0 %v2788_v44  ;;  %v3544_v63 = vld [vmem:[#allocation2 + $0x3ec] sm:$0xf0]  ;;  %v2765_v1 = vld [vmem:[#allocation2 + $0xf0] sm:$0xf0]  ;;  %v3543_v2 = vld [vmem:[#allocation2 + $0x3c4] sm:$0xf]  ;;  %v2764_v4 = vor.u32 %v3520_v60, %v2763_v59 }
  0x15   :  { %430 = vmatpush.bf16.msra.mxu1 %v2884_v45  ;;  %v2861_v3 = vld [vmem:[#allocation2 + $0x3f0] sm:$0xf0]  ;;  %v2860_v5 = vor.u32 %v3544_v63, %v2859_v61  ;;  %v2768_v6 = vor.u32 %v3519_v0, %v2765_v1  ;;  %v2751_v7 = vld [vmem:[#allocation2 + $0x60] sm:$0xf]  ;;  %v3517_v8 = vld [vmem:[#allocation2 + $0x8c] sm:$0xf0] }
  0x16   :  { %459 = vmatpush.bf16.msra.mxu2 %v2792_v46  ;;  %v2847_v9 = vld [vmem:[#allocation2 + $0x360] sm:$0xf]  ;;  %v2864_v10 = vor.u32 %v3543_v2, %v2861_v3  ;;  %v3541_v11 = vld [vmem:[#allocation2 + $0x38c] sm:$0xf0]  ;;  %v3516_v12 = vld [vmem:[#allocation2 + $0x64] sm:$0xf]  ;;  %v2752_v16 = vor.u32 %v3517_v8, %v2751_v7 }
  0x17   :  { %488 = vmatpush.bf16.msra.mxu3 %v2888_v50  ;;  %v2753_v13 = vld [vmem:[#allocation2 + $0x90] sm:$0xf0]  ;;  %v3540_v14 = vld [vmem:[#allocation2 + $0x364] sm:$0xf]  ;;  %v2739_v17 = vld [vmem:[#allocation2] sm:$0xf]  ;;  %v2848_v19 = vor.u32 %v3541_v11, %v2847_v9 }
  0x18   :  { %402 = vmatpush.bf16.msra.mxu0 %v2776_v56  ;;  %v2849_v15 = vld [vmem:[#allocation2 + $0x390] sm:$0xf0]  ;;  %v3514_v18 = vld [vmem:[#allocation2 + $0x2c] sm:$0xf0]  ;;  %v2756_v20 = vor.u32 %v3516_v12, %v2753_v13  ;;  %v2835_v21 = vld [vmem:[#allocation2 + $0x300] sm:$0xf] }
  0x19   :  { %431 = vmatpush.bf16.msra.mxu1 %v2872_v57  ;;  %v3538_v22 = vld [vmem:[#allocation2 + $0x32c] sm:$0xf0]  ;;  %v3513_v23 = vld [vmem:[#allocation2 + $0x4] sm:$0xf]  ;;  %v2852_v24 = vor.u32 %v3540_v14, %v2849_v15  ;;  %v2741_v25 = vld [vmem:[#allocation2 + $0x30] sm:$0xf0]  ;;  %v2740_v31 = vor.u32 %v3514_v18, %v2739_v17 }
  0x1a   :  { %460 = vmatpush.bf16.msra.mxu2 %v2780_v58  ;;  %v3537_v26 = vld [vmem:[#allocation2 + $0x304] sm:$0xf]  ;;  %v2837_v27 = vld [vmem:[#allocation2 + $0x330] sm:$0xf0]  ;;  %v2707_v28 = vld [vmem:[%s4253_s0] sm:$0xf]  ;;  %v2836_v35 = vor.u32 %v3538_v22, %v2835_v21  ;;  %v2744_v36 = vor.u32 %v3513_v23, %v2741_v25 }
  0x1b   :  { %489 = vmatpush.bf16.msra.mxu3 %v2876_v62  ;;  %v3043_v29 = vld [vmem:[#allocation2 + $0x2ac] sm:$0xf]  ;;  %v3591_v30 = vld [vmem:[#allocation2 + $0x2d8] sm:$0xf0]  ;;  %v3506_v32 = vld [vmem:[%s4253_s0 + $0x4] sm:$0xf0]  ;;  %v2840_v39 = vor.u32 %v3537_v26, %v2837_v27 }
  0x1c   :  { %403 = vmatpush.bf16.msra.mxu0 %v2764_v4  ;;  %v3171_v33 = vld [vmem:[#allocation2 + $0x5ac] sm:$0xf]  ;;  %v3623_v34 = vld [vmem:[#allocation2 + $0x5d8] sm:$0xf0]  ;;  %v3505_v37 = vld [vmem:[%s4253_s0 + $0x4] sm:$0xf]  ;;  %v3044_v40 = vor.u32 %v3591_v30, %v3043_v29  ;;  %v3796_v44 = vor.u32 %v3506_v32, %v2707_v28 }
  0x1d   :  { %432 = vmatpush.bf16.msra.mxu1 %v2860_v5  ;;  %v2709_v38 = vld [vmem:[%s4253_s0 + $0x8] sm:$0xf0]  ;;  %v2831_v41 = vld [vmem:[#allocation2 + $0x2a8] sm:$0xf]  ;;  %v3536_v42 = vld [vmem:[#allocation2 + $0x2d4] sm:$0xf0]  ;;  %v3172_v45 = vor.u32 %v3623_v34, %v3171_v33 }
  0x1e   :  { %461 = vmatpush.bf16.msra.mxu2 %v2768_v6  ;;  %v2927_v43 = vld [vmem:[#allocation2 + $0x5a8] sm:$0xf]  ;;  %v3560_v46 = vld [vmem:[#allocation2 + $0x5d4] sm:$0xf0]  ;;  %v3027_v47 = vld [vmem:[#allocation2 + $0x24c] sm:$0xf]  ;;  %v3798_v49 = vor.u32 %v3505_v37, %v2709_v38  ;;  %v2832_v52 = vor.u32 %v3536_v42, %v2831_v41 }
  0x1f   :  { %490 = vmatpush.bf16.msra.mxu3 %v2864_v10  ;;  %v3587_v48 = vld [vmem:[#allocation2 + $0x278] sm:$0xf0]  ;;  %v3155_v50 = vld [vmem:[#allocation2 + $0x54c] sm:$0xf]  ;;  %v2928_v53 = vor.u32 %v3560_v46, %v2927_v43  ;;  %v2819_v55 = vld [vmem:[#allocation2 + $0x248] sm:$0xf] }
  0x20   :  { %404 = vmatpush.bf16.msra.mxu0 %v2752_v16  ;;  %v3619_v51 = vld [vmem:[#allocation2 + $0x578] sm:$0xf0]  ;;  %v3028_v54 = vor.u32 %v3587_v48, %v3027_v47  ;;  %v3533_v56 = vld [vmem:[#allocation2 + $0x274] sm:$0xf0]  ;;  %v2915_v57 = vld [vmem:[#allocation2 + $0x548] sm:$0xf] }
  0x21   :  { %433 = vmatpush.bf16.msra.mxu1 %v2848_v19  ;;  %v3156_v58 = vor.u32 %v3619_v51, %v3155_v50  ;;  %v3557_v59 = vld [vmem:[#allocation2 + $0x574] sm:$0xf0]  ;;  %v3011_v60 = vld [vmem:[#allocation2 + $0x1ec] sm:$0xf]  ;;  %v3583_v61 = vld [vmem:[#allocation2 + $0x218] sm:$0xf0]  ;;  %v2820_v0 = vor.u32 %v3533_v56, %v2819_v55 }
  0x22   :  { %462 = vmatpush.bf16.msra.mxu2 %v2756_v20  ;;  %v3139_v62 = vld [vmem:[#allocation2 + $0x4ec] sm:$0xf]  ;;  %v3615_v63 = vld [vmem:[#allocation2 + $0x518] sm:$0xf0]  ;;  %v2807_v1 = vld [vmem:[#allocation2 + $0x1e8] sm:$0xf]  ;;  %v2916_v2 = vor.u32 %v3557_v59, %v2915_v57  ;;  %v3012_v3 = vor.u32 %v3583_v61, %v3011_v60 }
  0x23   :  { %491 = vmatpush.bf16.msra.mxu3 %v2852_v24  ;;  %v3530_v4 = vld [vmem:[#allocation2 + $0x214] sm:$0xf0]  ;;  %v2903_v5 = vld [vmem:[#allocation2 + $0x4e8] sm:$0xf]  ;;  %v3140_v7 = vor.u32 %v3615_v63, %v3139_v62  ;;  %v2995_v8 = vld [vmem:[#allocation2 + $0x18c] sm:$0xf] }
  0x24   :  { %405 = vmatpush.bf16.msra.mxu0 %v2740_v31  ;;  %v3554_v6 = vld [vmem:[#allocation2 + $0x514] sm:$0xf0]  ;;  %v3579_v9 = vld [vmem:[#allocation2 + $0x1b8] sm:$0xf0]  ;;  %v3123_v10 = vld [vmem:[#allocation2 + $0x48c] sm:$0xf]  ;;  %v2808_v14 = vor.u32 %v3530_v4, %v2807_v1 }
  0x25   :  { %434 = vmatpush.bf16.msra.mxu1 %v2836_v35  ;;  %v3611_v11 = vld [vmem:[#allocation2 + $0x4b8] sm:$0xf0]  ;;  %v2795_v12 = vld [vmem:[#allocation2 + $0x188] sm:$0xf]  ;;  %v3527_v13 = vld [vmem:[#allocation2 + $0x1b4] sm:$0xf0]  ;;  %v2904_v20 = vor.u32 %v3554_v6, %v2903_v5  ;;  %v2996_v21 = vor.u32 %v3579_v9, %v2995_v8 }
  0x26   :  { %463 = vmatpush.bf16.msra.mxu2 %v2744_v36  ;;  %v2891_v15 = vld [vmem:[#allocation2 + $0x488] sm:$0xf]  ;;  %v3551_v16 = vld [vmem:[#allocation2 + $0x4b4] sm:$0xf0]  ;;  %v2979_v17 = vld [vmem:[#allocation2 + $0x12c] sm:$0xf]  ;;  %v3124_v25 = vor.u32 %v3611_v11, %v3123_v10  ;;  %v2796_v28 = vor.u32 %v3527_v13, %v2795_v12 }
  0x27   :  { %492 = vmatpush.bf16.msra.mxu3 %v2840_v39  ;;  %406 = vmatmul.bf16.vlgmr.msra.gmra.mxu0 %v3796_v44  ;;  %v2715_v18 = vld [vmem:[%s4253_s0 + $0x10] sm:$0xf]  ;;  %v3508_v19 = vld [vmem:[%s4253_s0 + $0x14] sm:$0xf0]  ;;  %v3575_v22 = vld [vmem:[#allocation2 + $0x158] sm:$0xf0]  ;;  %v2892_v29 = vor.u32 %v3551_v16, %v2891_v15 }
  0x28   :  { %435 = vmatmul.bf16.vlgmr.msra.gmra.mxu1 %v3798_v49  ;;  %514 = vmatpush.bf16.msrb.mxu0 %v2832_v52  ;;  %v3107_v23 = vld [vmem:[#allocation2 + $0x42c] sm:$0xf]  ;;  %v3607_v24 = vld [vmem:[#allocation2 + $0x458] sm:$0xf0]  ;;  %v3507_v26 = vld [vmem:[%s4253_s0 + $0x14] sm:$0xf]  ;;  %v2980_v30 = vor.u32 %v3575_v22, %v2979_v17  ;;  %v3816_v34 = vor.u32 %v3508_v19, %v2715_v18 }
  0x29   :  { %464 = vmatmul.bf16.vlgmr.msra.gmra.mxu2 %v3796_v44  ;;  %543 = vmatpush.bf16.msrb.mxu1 %v2928_v53  ;;  %v2717_v27 = vld [vmem:[%s4253_s0 + $0x18] sm:$0xf0]  ;;  %v2783_v31 = vld [vmem:[#allocation2 + $0x128] sm:$0xf]  ;;  %v3524_v32 = vld [vmem:[#allocation2 + $0x154] sm:$0xf0]  ;;  %v3108_v35 = vor.u32 %v3607_v24, %v3107_v23 }
  0x2a   :  { %1121 = vmatpush.bf16.msrb.mxu2 %v3044_v40  ;;  %493 = vmatmul.bf16.vlgmr.msra.gmra.mxu3 %v3798_v49  ;;  %v2879_v33 = vld [vmem:[#allocation2 + $0x428] sm:$0xf]  ;;  %v3548_v36 = vld [vmem:[#allocation2 + $0x454] sm:$0xf0]  ;;  %v2963_v37 = vld [vmem:[#allocation2 + $0xcc] sm:$0xf]  ;;  %v3818_v39 = vor.u32 %v3507_v26, %v2717_v27  ;;  %v2784_v42 = vor.u32 %v3524_v32, %v2783_v31 }
  0x2b   :  { %1150 = vmatpush.bf16.msrb.mxu3 %v3172_v45  ;;  %v3571_v38 = vld [vmem:[#allocation2 + $0xf8] sm:$0xf0]  ;;  %v3091_v40 = vld [vmem:[#allocation2 + $0x3cc] sm:$0xf]  ;;  %v2880_v43 = vor.u32 %v3548_v36, %v2879_v33  ;;  %v2771_v46 = vld [vmem:[#allocation2 + $0xc8] sm:$0xf] }
  0x2c   :  { %515 = vmatpush.bf16.msrb.mxu0 %v2820_v0  ;;  %v3603_v41 = vld [vmem:[#allocation2 + $0x3f8] sm:$0xf0]  ;;  %v2964_v45 = vor.u32 %v3571_v38, %v2963_v37  ;;  %v3521_v47 = vld [vmem:[#allocation2 + $0xf4] sm:$0xf0]  ;;  %v2867_v50 = vld [vmem:[#allocation2 + $0x3c8] sm:$0xf] }
  0x2d   :  { %544 = vmatpush.bf16.msrb.mxu1 %v2916_v2  ;;  %v3092_v48 = vor.u32 %v3603_v41, %v3091_v40  ;;  %v3545_v51 = vld [vmem:[#allocation2 + $0x3f4] sm:$0xf0]  ;;  %v2772_v52 = vor.u32 %v3521_v47, %v2771_v46  ;;  %v2947_v53 = vld [vmem:[#allocation2 + $0x6c] sm:$0xf]  ;;  %v2759_v59 = vld [vmem:[#allocation2 + $0x68] sm:$0xf] }
  0x2e   :  { %1122 = vmatpush.bf16.msrb.mxu2 %v3028_v54  ;;  %v3567_v54 = vld [vmem:[#allocation2 + $0x98] sm:$0xf0]  ;;  %v3075_v55 = vld [vmem:[#allocation2 + $0x36c] sm:$0xf]  ;;  %v2868_v56 = vor.u32 %v3545_v51, %v2867_v50  ;;  %v3518_v60 = vld [vmem:[#allocation2 + $0x94] sm:$0xf0] }
  0x2f   :  { %1151 = vmatpush.bf16.msrb.mxu3 %v3156_v58  ;;  %v2948_v57 = vor.u32 %v3567_v54, %v2947_v53  ;;  %v3599_v58 = vld [vmem:[#allocation2 + $0x398] sm:$0xf0]  ;;  %v2855_v62 = vld [vmem:[#allocation2 + $0x368] sm:$0xf]  ;;  %v3542_v63 = vld [vmem:[#allocation2 + $0x394] sm:$0xf0]  ;;  %v2760_v4 = vor.u32 %v3518_v60, %v2759_v59 }
  0x30   :  { %516 = vmatpush.bf16.msrb.mxu0 %v2808_v14  ;;  %v3076_v61 = vor.u32 %v3599_v58, %v3075_v55  ;;  %v2931_v0 = vld [vmem:[#allocation2 + $0xc] sm:$0xf]  ;;  %v3563_v1 = vld [vmem:[#allocation2 + $0x38] sm:$0xf0]  ;;  %v2856_v5 = vor.u32 %v3542_v63, %v2855_v62  ;;  %v3515_v8 = vld [vmem:[#allocation2 + $0x34] sm:$0xf0] }
  0x31   :  { %545 = vmatpush.bf16.msrb.mxu1 %v2904_v20  ;;  %v3059_v2 = vld [vmem:[#allocation2 + $0x30c] sm:$0xf]  ;;  %v2932_v6 = vor.u32 %v3563_v1, %v2931_v0  ;;  %v2843_v10 = vld [vmem:[#allocation2 + $0x308] sm:$0xf]  ;;  %v3539_v11 = vld [vmem:[#allocation2 + $0x334] sm:$0xf0] }
  0x32   :  { %1123 = vmatpush.bf16.msrb.mxu2 %v3012_v3  ;;  %v3595_v3 = vld [vmem:[#allocation2 + $0x338] sm:$0xf0]  ;;  %v2723_v12 = vld [vmem:[%s4253_s0 + $0x20] sm:$0xf]  ;;  %v3510_v13 = vld [vmem:[%s4253_s0 + $0x24] sm:$0xf0]  ;;  %v2844_v17 = vor.u32 %v3539_v11, %v2843_v10 }
  0x33   :  { %1152 = vmatpush.bf16.msrb.mxu3 %v3140_v7  ;;  %v2747_v7 = vld [vmem:[#allocation2 + $0x8] sm:$0xf]  ;;  %v3060_v9 = vor.u32 %v3595_v3, %v3059_v2  ;;  %v3509_v14 = vld [vmem:[%s4253_s0 + $0x24] sm:$0xf]  ;;  %v2725_v15 = vld [vmem:[%s4253_s0 + $0x28] sm:$0xf0]  ;;  %v3836_v18 = vor.u32 %v3510_v13, %v2723_v12 }
  0x34   :  { %517 = vmatpush.bf16.msrb.mxu0 %v2796_v28  ;;  %v2748_v16 = vor.u32 %v3515_v8, %v2747_v7  ;;  %v3838_v19 = vor.u32 %v3509_v14, %v2725_v15  ;;  %v3051_v20 = vld [vmem:[#allocation2 + $0x2b4] sm:$0xf]  ;;  %v3624_v24 = vld [vmem:[#allocation2 + $0x5e0] sm:$0xf0]  ;;  %v3045_v26 = vld [vmem:[#allocation2 + $0x2dc] sm:$0xf0] }
  0x35   :  { %546 = vmatpush.bf16.msrb.mxu1 %v2892_v29  ;;  %v3179_v22 = vld [vmem:[#allocation2 + $0x5b4] sm:$0xf]  ;;  %v3621_v29 = vld [vmem:[#allocation2 + $0x5b0] sm:$0xf]  ;;  %v3588_v33 = vld [vmem:[#allocation2 + $0x280] sm:$0xf0] }
  0x36   :  { %1124 = vmatpush.bf16.msrb.mxu2 %v2996_v21  ;;  %v3592_v21 = vld [vmem:[#allocation2 + $0x2e0] sm:$0xf0]  ;;  %v3180_v27 = vor.u32 %v3624_v24, %v3179_v22  ;;  %v3035_v31 = vld [vmem:[#allocation2 + $0x254] sm:$0xf]  ;;  %v3585_v40 = vld [vmem:[#allocation2 + $0x250] sm:$0xf] }
  0x37   :  { %1153 = vmatpush.bf16.msrb.mxu3 %v3124_v25  ;;  %411 = vmatmul.bf16.gmra.mxu0 %v3816_v34  ;;  %v3052_v23 = vor.u32 %v3592_v21, %v3051_v20  ;;  %v3589_v25 = vld [vmem:[#allocation2 + $0x2b0] sm:$0xf]  ;;  %v3620_v36 = vld [vmem:[#allocation2 + $0x580] sm:$0xf0]  ;;  %v3036_v37 = vor.u32 %v3588_v33, %v3035_v31  ;;  %v3029_v41 = vld [vmem:[#allocation2 + $0x27c] sm:$0xf0] }
  0x38   :  { %440 = vmatmul.bf16.gmra.mxu1 %v3818_v39  ;;  %518 = vmatpush.bf16.msrb.mxu0 %v2784_v42  ;;  %v3048_v28 = vor.u32 %v3589_v25, %v3045_v26  ;;  %v3617_v42 = vld [vmem:[#allocation2 + $0x550] sm:$0xf]  ;;  %v3511_v50 = vld [vmem:[%s4253_s0 + $0x34] sm:$0xf]  ;;  %v2733_v51 = vld [vmem:[%s4253_s0 + $0x38] sm:$0xf0] }
  0x39   :  { %469 = vmatmul.bf16.gmra.mxu2 %v3816_v34  ;;  %547 = vmatpush.bf16.msrb.mxu1 %v2880_v43  ;;  %v3032_v43 = vor.u32 %v3585_v40, %v3029_v41  ;;  %v2731_v47 = vld [vmem:[%s4253_s0 + $0x30] sm:$0xf]  ;;  %v3858_v53 = vor.u32 %v3511_v50, %v2733_v51  ;;  %v3019_v54 = vld [vmem:[#allocation2 + $0x1f4] sm:$0xf]  ;;  %v3584_v55 = vld [vmem:[#allocation2 + $0x220] sm:$0xf0] }
  0x3a   :  { %1125 = vmatpush.bf16.msrb.mxu2 %v2980_v30  ;;  %498 = vmatmul.bf16.gmra.mxu3 %v3818_v39  ;;  %v3173_v30 = vld [vmem:[#allocation2 + $0x5dc] sm:$0xf0]  ;;  %v3616_v58 = vld [vmem:[#allocation2 + $0x520] sm:$0xf0]  ;;  %v3581_v59 = vld [vmem:[#allocation2 + $0x1f0] sm:$0xf] }
  0x3b   :  { %1154 = vmatpush.bf16.msrb.mxu3 %v3108_v35  ;;  %v3176_v32 = vor.u32 %v3621_v29, %v3173_v30  ;;  %v3163_v35 = vld [vmem:[#allocation2 + $0x554] sm:$0xf]  ;;  %v3013_v60 = vld [vmem:[#allocation2 + $0x21c] sm:$0xf0]  ;;  %v3613_v63 = vld [vmem:[#allocation2 + $0x4f0] sm:$0xf] }
  0x3c   :  { %519 = vmatpush.bf16.msrb.mxu0 %v2772_v52  ;;  %v3164_v38 = vor.u32 %v3620_v36, %v3163_v35  ;;  %v3016_v62 = vor.u32 %v3581_v59, %v3013_v60  ;;  %v3141_v0 = vld [vmem:[#allocation2 + $0x51c] sm:$0xf0]  ;;  %v3003_v1 = vld [vmem:[#allocation2 + $0x194] sm:$0xf]  ;;  %v3580_v3 = vld [vmem:[#allocation2 + $0x1c0] sm:$0xf0] }
  0x3d   :  { %548 = vmatpush.bf16.msrb.mxu1 %v2868_v56  ;;  %v3147_v56 = vld [vmem:[#allocation2 + $0x4f4] sm:$0xf]  ;;  %v3144_v2 = vor.u32 %v3613_v63, %v3141_v0  ;;  %v3577_v8 = vld [vmem:[#allocation2 + $0x190] sm:$0xf]  ;;  %v3125_v12 = vld [vmem:[#allocation2 + $0x4bc] sm:$0xf0] }
  0x3e   :  { %1126 = vmatpush.bf16.msrb.mxu2 %v2964_v45  ;;  %v3157_v45 = vld [vmem:[#allocation2 + $0x57c] sm:$0xf0]  ;;  %v3609_v10 = vld [vmem:[#allocation2 + $0x490] sm:$0xf]  ;;  %v2987_v14 = vld [vmem:[#allocation2 + $0x134] sm:$0xf] }
  0x3f   :  { %1155 = vmatpush.bf16.msrb.mxu3 %v3092_v48  ;;  %v3160_v46 = vor.u32 %v3617_v42, %v3157_v45  ;;  %v3512_v48 = vld [vmem:[%s4253_s0 + $0x34] sm:$0xf0]  ;;  %v3128_v13 = vor.u32 %v3609_v10, %v3125_v12  ;;  %v3576_v15 = vld [vmem:[#allocation2 + $0x160] sm:$0xf0]  ;;  %v3573_v21 = vld [vmem:[#allocation2 + $0x130] sm:$0xf] }
  0x40   :  { %520 = vmatpush.bf16.msrb.mxu0 %v2760_v4  ;;  %v3856_v52 = vor.u32 %v3512_v48, %v2731_v47  ;;  %v3131_v4 = vld [vmem:[#allocation2 + $0x494] sm:$0xf]  ;;  %v3608_v20 = vld [vmem:[#allocation2 + $0x460] sm:$0xf0]  ;;  %v2981_v22 = vld [vmem:[#allocation2 + $0x15c] sm:$0xf0] }
  0x41   :  { %549 = vmatpush.bf16.msrb.mxu1 %v2856_v5  ;;  %v3612_v5 = vld [vmem:[#allocation2 + $0x4c0] sm:$0xf0]  ;;  %v2984_v24 = vor.u32 %v3573_v21, %v2981_v22  ;;  %v3605_v25 = vld [vmem:[#allocation2 + $0x430] sm:$0xf]  ;;  %v3109_v26 = vld [vmem:[#allocation2 + $0x45c] sm:$0xf0] }
  0x42   :  { %1127 = vmatpush.bf16.msrb.mxu2 %v2948_v57  ;;  %v3020_v57 = vor.u32 %v3584_v55, %v3019_v54  ;;  %v3132_v7 = vor.u32 %v3612_v5, %v3131_v4  ;;  %v3572_v29 = vld [vmem:[#allocation2 + $0x100] sm:$0xf0]  ;;  %v3099_v30 = vld [vmem:[#allocation2 + $0x3d4] sm:$0xf]  ;;  %v3569_v35 = vld [vmem:[#allocation2 + $0xd0] sm:$0xf] }
  0x43   :  { %1156 = vmatpush.bf16.msrb.mxu3 %v3076_v61  ;;  %v3148_v61 = vor.u32 %v3616_v58, %v3147_v56  ;;  %v3604_v31 = vld [vmem:[#allocation2 + $0x400] sm:$0xf0]  ;;  %v2965_v36 = vld [vmem:[#allocation2 + $0xfc] sm:$0xf0]  ;;  %v2955_v42 = vld [vmem:[#allocation2 + $0x74] sm:$0xf] }
  0x44   :  { %521 = vmatpush.bf16.msrb.mxu0 %v2748_v16  ;;  %v3115_v16 = vld [vmem:[#allocation2 + $0x434] sm:$0xf]  ;;  %v3100_v33 = vor.u32 %v3604_v31, %v3099_v30  ;;  %v3093_v40 = vld [vmem:[#allocation2 + $0x3fc] sm:$0xf0]  ;;  %v3600_v47 = vld [vmem:[#allocation2 + $0x3a0] sm:$0xf0] }
  0x45   :  { %550 = vmatpush.bf16.msrb.mxu1 %v2844_v17  ;;  %v2988_v17 = vor.u32 %v3576_v15, %v2987_v14  ;;  %v3083_v45 = vld [vmem:[#allocation2 + $0x374] sm:$0xf]  ;;  %v3565_v48 = vld [vmem:[#allocation2 + $0x70] sm:$0xf]  ;;  %v2949_v50 = vld [vmem:[#allocation2 + $0x9c] sm:$0xf0] }
  0x46   :  { %1128 = vmatpush.bf16.msrb.mxu2 %v2932_v6  ;;  %v3004_v6 = vor.u32 %v3580_v3, %v3003_v1  ;;  %v3084_v51 = vor.u32 %v3600_v47, %v3083_v45  ;;  %v2952_v54 = vor.u32 %v3565_v48, %v2949_v50  ;;  %v3597_v55 = vld [vmem:[#allocation2 + $0x370] sm:$0xf]  ;;  %v3077_v56 = vld [vmem:[#allocation2 + $0x39c] sm:$0xf0]  ;;  %v3564_v59 = vld [vmem:[#allocation2 + $0x40] sm:$0xf0] }
  0x47   :  { %1157 = vmatpush.bf16.msrb.mxu3 %v3060_v9  ;;  %416 = vmatmul.bf16.gmra.mxu0 %v3836_v18  ;;  %v2997_v9 = vld [vmem:[#allocation2 + $0x1bc] sm:$0xf0]  ;;  %v3080_v58 = vor.u32 %v3597_v55, %v3077_v56  ;;  %v3067_v60 = vld [vmem:[#allocation2 + $0x314] sm:$0xf]  ;;  %v3561_v0 = vld [vmem:[#allocation2 + $0x10] sm:$0xf] }
  0x48   :  { %445 = vmatmul.bf16.gmra.mxu1 %v3838_v19  ;;  %1179 = vmatpush.bf16.msra.mxu0 %v3048_v28  ;;  %v3000_v11 = vor.u32 %v3577_v8, %v2997_v9  ;;  %v3112_v28 = vor.u32 %v3605_v25, %v3109_v26  ;;  %v2933_v1 = vld [vmem:[#allocation2 + $0x3c] sm:$0xf0]  ;;  %v3487_v8 = vld [vmem:[#allocation2 + $0x5bc] sm:$0xf]  ;;  %v3702_v10 = vld [vmem:[#allocation2 + $0x5e8] sm:$0xf0] }
  0x49   :  { %474 = vmatmul.bf16.gmra.mxu2 %v3836_v18  ;;  %1208 = vmatpush.bf16.msra.mxu1 %v3176_v32  ;;  %v2936_v3 = vor.u32 %v3561_v0, %v2933_v1  ;;  %v3061_v4 = vld [vmem:[#allocation2 + $0x33c] sm:$0xf0]  ;;  %v3590_v12 = vld [vmem:[#allocation2 + $0x2b8] sm:$0xf]  ;;  %v3165_v30 = vld [vmem:[#allocation2 + $0x584] sm:$0xf0] }
  0x4a   :  { %503 = vmatmul.bf16.gmra.mxu3 %v3838_v19  ;;  %1237 = vmatpush.bf16.msra.mxu2 %v3052_v23  ;;  %v3116_v23 = vor.u32 %v3608_v20, %v3115_v16  ;;  %v3622_v14 = vld [vmem:[#allocation2 + $0x5b8] sm:$0xf]  ;;  %v3181_v16 = vld [vmem:[#allocation2 + $0x5e4] sm:$0xf0]  ;;  %v3657_v20 = vld [vmem:[#allocation2 + $0x288] sm:$0xf0] }
  0x4b   :  { %1266 = vmatpush.bf16.msra.mxu3 %v3180_v27  ;;  %v2971_v27 = vld [vmem:[#allocation2 + $0xd4] sm:$0xf]  ;;  %v3184_v21 = vor.u32 %v3622_v14, %v3181_v16  ;;  %v3586_v26 = vld [vmem:[#allocation2 + $0x258] sm:$0xf]  ;;  %v3287_v31 = vld [vmem:[#allocation2 + $0x1fc] sm:$0xf] }
  0x4c   :  { %1180 = vmatpush.bf16.msra.mxu0 %v3032_v43  ;;  %v2972_v32 = vor.u32 %v3572_v29, %v2971_v27  ;;  %v3568_v43 = vld [vmem:[#allocation2 + $0xa0] sm:$0xf0]  ;;  %v3037_v27 = vld [vmem:[#allocation2 + $0x284] sm:$0xf0]  ;;  %v3647_v47 = vld [vmem:[#allocation2 + $0x1c8] sm:$0xf0] }
  0x4d   :  { %1209 = vmatpush.bf16.msra.mxu1 %v3160_v46  ;;  %v2956_v46 = vor.u32 %v3568_v43, %v2955_v42  ;;  %v3040_v29 = vor.u32 %v3586_v26, %v3037_v27  ;;  %v3614_v42 = vld [vmem:[#allocation2 + $0x4f8] sm:$0xf]  ;;  %v3149_v45 = vld [vmem:[#allocation2 + $0x524] sm:$0xf0]  ;;  %v3247_v0 = vld [vmem:[#allocation2 + $0x13c] sm:$0xf] }
  0x4e   :  { %1238 = vmatpush.bf16.msra.mxu2 %v3036_v37  ;;  %v3601_v37 = vld [vmem:[#allocation2 + $0x3d0] sm:$0xf]  ;;  %v3152_v48 = vor.u32 %v3614_v42, %v3149_v45  ;;  %v3642_v1 = vld [vmem:[#allocation2 + $0x168] sm:$0xf0]  ;;  %v2989_v16 = vld [vmem:[#allocation2 + $0x164] sm:$0xf0] }
  0x4f   :  { %1267 = vmatpush.bf16.msra.mxu3 %v3164_v38  ;;  %v2968_v38 = vor.u32 %v3569_v35, %v2965_v36  ;;  %v3096_v41 = vor.u32 %v3601_v37, %v3093_v40  ;;  %v3447_v36 = vld [vmem:[#allocation2 + $0x4fc] sm:$0xf]  ;;  %v3692_v37 = vld [vmem:[#allocation2 + $0x528] sm:$0xf0]  ;;  %v3582_v40 = vld [vmem:[#allocation2 + $0x1f8] sm:$0xf] }
  0x50   :  { %1181 = vmatpush.bf16.msra.mxu0 %v3016_v62  ;;  %v3387_v27 = vld [vmem:[#allocation2 + $0x3dc] sm:$0xf]  ;;  %vm644_vm0 = vcmask 1045504   ;;  %vm1457_vm1 = vcmask 1044480   ;;  %vm2488_vm2 = vcmask 1043456   ;;  %vm2590_vm3 = vcmask 1041409  }
  0x51   :  { %1210 = vmatpush.bf16.msra.mxu1 %v3144_v2  ;;  %v3593_v2 = vld [vmem:[#allocation2 + $0x310] sm:$0xf]  ;;  %v3207_v45 = vld [vmem:[#allocation2 + $0x7c] sm:$0xf]  ;;  %vm2593_vm4 = vcmask 1042434   ;;  %vm2596_vm5 = vcmask 1043459  }
  0x52   :  { %1239 = vmatpush.bf16.msra.mxu2 %v3020_v57  ;;  %v2939_v57 = vld [vmem:[#allocation2 + $0x14] sm:$0xf]  ;;  %v3064_v5 = vor.u32 %v3593_v2, %v3061_v4  ;;  %v3248_v4 = vor.u32 %v3642_v1, %v3247_v0  ;;  %v3598_v1 = vld [vmem:[#allocation2 + $0x378] sm:$0xf]  ;;  %vm2599_vm6 = vcmask 1044484   ;;  %vm2602_vm7 = vcmask 1045509  }
  0x53   :  { %1268 = vmatpush.bf16.msra.mxu3 %v3148_v61  ;;  %v3596_v61 = vld [vmem:[#allocation2 + $0x340] sm:$0xf0]  ;;  %v2940_v62 = vor.u32 %v3564_v59, %v2939_v57  ;;  %v3578_v59 = vld [vmem:[#allocation2 + $0x198] sm:$0xf]  ;;  %vm2605_vm8 = vcmask 1046534   ;;  %vm2608_vm9 = vcmask 1047559  }
  0x54   :  { %1182 = vmatpush.bf16.msra.mxu0 %v3000_v11  ;;  %v3068_v63 = vor.u32 %v3596_v61, %v3067_v60  ;;  %v3488_v11 = vor.u32 %v3702_v10, %v3487_v8  ;;  %v3005_v60 = vld [vmem:[#allocation2 + $0x1c4] sm:$0xf0]  ;;  %v3610_v61 = vld [vmem:[#allocation2 + $0x498] sm:$0xf]  ;;  %s3757_s8 = smov 127   ;;  %s3758_s9 = smov 1  }
  0x55   :  { %1211 = vmatpush.bf16.msra.mxu1 %v3128_v13  ;;  %v3053_v13 = vld [vmem:[#allocation2 + $0x2e4] sm:$0xf0] }
  0x56   :  { %1240 = vmatpush.bf16.msra.mxu2 %v3004_v6  ;;  %v3327_v6 = vld [vmem:[#allocation2 + $0x2bc] sm:$0xf]  ;;  %v3056_v15 = vor.u32 %v3590_v12, %v3053_v13 }
  0x57   :  { %421 = vmatmul.bf16.gmra.mxu0 %v3856_v52  ;;  %1269 = vmatpush.bf16.msra.mxu3 %v3132_v7  ;;  %v3662_v7 = vld [vmem:[#allocation2 + $0x2e8] sm:$0xf0] }
  0x58   :  { %450 = vmatmul.bf16.gmra.mxu1 %v3858_v53  ;;  %1183 = vmatpush.bf16.msra.mxu0 %v2984_v24  ;;  %v3328_v9 = vor.u32 %v3662_v7, %v3327_v6  ;;  %v3697_v24 = vld [vmem:[#allocation2 + $0x588] sm:$0xf0] }
  0x59   :  { %479 = vmatmul.bf16.gmra.mxu2 %v3856_v52  ;;  %1212 = vmatpush.bf16.msra.mxu1 %v3112_v28  ;;  %v3618_v28 = vld [vmem:[#allocation2 + $0x558] sm:$0xf]  ;;  %v3682_v6 = vld [vmem:[#allocation2 + $0x468] sm:$0xf0] }
  0x5a   :  { %508 = vmatmul.bf16.gmra.mxu3 %v3858_v53  ;;  %1241 = vmatpush.bf16.msra.mxu2 %v2988_v17  ;;  %v3307_v17 = vld [vmem:[#allocation2 + $0x25c] sm:$0xf] }
  0x5b   :  { %1270 = vmatpush.bf16.msra.mxu3 %v3116_v23  ;;  %v3308_v22 = vor.u32 %v3657_v20, %v3307_v17  ;;  %v3467_v23 = vld [vmem:[#allocation2 + $0x55c] sm:$0xf]  ;;  %v3606_v17 = vld [vmem:[#allocation2 + $0x438] sm:$0xf] }
  0x5c   :  { %1184 = vmatpush.bf16.msra.mxu0 %v2968_v38  ;;  %v3468_v25 = vor.u32 %v3697_v24, %v3467_v23  ;;  %v3448_v38 = vor.u32 %v3692_v37, %v3447_v36  ;;  %v3637_v23 = vld [vmem:[#allocation2 + $0x108] sm:$0xf0] }
  0x5d   :  { %1213 = vmatpush.bf16.msra.mxu1 %v3096_v41  ;;  %v3021_v41 = vld [vmem:[#allocation2 + $0x224] sm:$0xf0] }
  0x5e   :  { %1242 = vmatpush.bf16.msra.mxu2 %v2972_v32  ;;  %v3652_v32 = vld [vmem:[#allocation2 + $0x228] sm:$0xf0]  ;;  %v3024_v43 = vor.u32 %v3582_v40, %v3021_v41  ;;  %v2973_v40 = vld [vmem:[#allocation2 + $0x104] sm:$0xf0]  ;;  %v3602_v41 = vld [vmem:[#allocation2 + $0x3d8] sm:$0xf] }
  0x5f   :  { %1271 = vmatpush.bf16.msra.mxu3 %v3100_v33  ;;  %v3168_v33 = vor.u32 %v3618_v28, %v3165_v30  ;;  %v3288_v35 = vor.u32 %v3652_v32, %v3287_v31  ;;  %v3677_v28 = vld [vmem:[#allocation2 + $0x408] sm:$0xf0] }
  0x60   :  { %1185 = vmatpush.bf16.msra.mxu0 %v2952_v54  ;;  %v3687_v54 = vld [vmem:[#allocation2 + $0x4c8] sm:$0xf0]  ;;  %v3388_v31 = vor.u32 %v3677_v28, %v3387_v27 }
  0x61   :  { %1214 = vmatpush.bf16.msra.mxu1 %v3080_v58 }
  0x62   :  { %1243 = vmatpush.bf16.msra.mxu2 %v2956_v46  ;;  %v3267_v46 = vld [vmem:[#allocation2 + $0x19c] sm:$0xf] }
  0x63   :  { %1272 = vmatpush.bf16.msra.mxu3 %v3084_v51  ;;  %v3268_v50 = vor.u32 %v3647_v47, %v3267_v46  ;;  %v3427_v51 = vld [vmem:[#allocation2 + $0x49c] sm:$0xf]  ;;  %v3632_v46 = vld [vmem:[#allocation2 + $0xa8] sm:$0xf0] }
  0x64   :  { %1186 = vmatpush.bf16.msra.mxu0 %v2936_v3  ;;  %v3428_v56 = vor.u32 %v3687_v54, %v3427_v51  ;;  %v3367_v51 = vld [vmem:[#allocation2 + $0x37c] sm:$0xf]  ;;  %v3672_v54 = vld [vmem:[#allocation2 + $0x3a8] sm:$0xf0] }
  0x65   :  { %1215 = vmatpush.bf16.msra.mxu1 %v3064_v5  ;;  %v3407_v5 = vld [vmem:[#allocation2 + $0x43c] sm:$0xf] }
  0x66   :  { %1244 = vmatpush.bf16.msra.mxu2 %v2940_v62  ;;  %v3008_v62 = vor.u32 %v3578_v59, %v3005_v60 }
  0x67   :  { %522 = vmatmul.bf16.vlgmr.msrb.gmra.mxu0 %v3796_v44  ;;  %1273 = vmatpush.bf16.msra.mxu3 %v3068_v63  ;;  %v3133_v63 = vld [vmem:[#allocation2 + $0x4c4] sm:$0xf0] }
  0x68   :  { %551 = vmatmul.bf16.vlgmr.msrb.gmra.mxu1 %v3798_v49  ;;  %1295 = vmatpush.bf16.msrb.mxu0 %v3056_v15  ;;  %v3136_v3 = vor.u32 %v3610_v61, %v3133_v63  ;;  %v3574_v15 = vld [vmem:[#allocation2 + $0x138] sm:$0xf]  ;;  %v2957_v63 = vld [vmem:[#allocation2 + $0xa4] sm:$0xf0] }
  0x69   :  { %1129 = vmatmul.bf16.vlgmr.msrb.gmra.mxu2 %v3796_v44  ;;  %1324 = vmatpush.bf16.msrb.mxu1 %v3184_v21  ;;  %v2992_v20 = vor.u32 %v3574_v15, %v2989_v16  ;;  %v3117_v21 = vld [vmem:[#allocation2 + $0x464] sm:$0xf0]  ;;  %v3594_v15 = vld [vmem:[#allocation2 + $0x318] sm:$0xf] }
  0x6a   :  { %1158 = vmatmul.bf16.vlgmr.msrb.gmra.mxu3 %v3798_v49  ;;  %2062 = vmatpush.bf16.msrb.mxu2 %v3328_v9  ;;  %v3408_v9 = vor.u32 %v3682_v6, %v3407_v5  ;;  %v3187_v5 = vld [vmem:[#allocation2 + $0x1c] sm:$0xf]  ;;  %v3627_v6 = vld [vmem:[#allocation2 + $0x48] sm:$0xf0] }
  0x6b   :  { %2091 = vmatpush.bf16.msrb.mxu3 %v3488_v11 }
  0x6c   :  { %1296 = vmatpush.bf16.msrb.mxu0 %v3040_v29 }
  0x6d   :  { %1325 = vmatpush.bf16.msrb.mxu1 %v3168_v33 }
  0x6e   :  { %2063 = vmatpush.bf16.msrb.mxu2 %v3308_v22  ;;  %v3227_v22 = vld [vmem:[#allocation2 + $0xdc] sm:$0xf] }
  0x6f   :  { %2092 = vmatpush.bf16.msrb.mxu3 %v3468_v25  ;;  %v3120_v25 = vor.u32 %v3606_v17, %v3117_v21  ;;  %v3228_v26 = vor.u32 %v3637_v23, %v3227_v22  ;;  %v3069_v21 = vld [vmem:[#allocation2 + $0x344] sm:$0xf0] }
  0x70   :  { %1297 = vmatpush.bf16.msrb.mxu0 %v3024_v43  ;;  %v3101_v43 = vld [vmem:[#allocation2 + $0x404] sm:$0xf0] }
  0x71   :  { %1326 = vmatpush.bf16.msrb.mxu1 %v3152_v48  ;;  %v3104_v48 = vor.u32 %v3602_v41, %v3101_v43 }
  0x72   :  { %2064 = vmatpush.bf16.msrb.mxu2 %v3288_v35 }
  0x73   :  { %2093 = vmatpush.bf16.msrb.mxu3 %v3448_v38  ;;  %v3570_v38 = vld [vmem:[#allocation2 + $0xd8] sm:$0xf] }
  0x74   :  { %1298 = vmatpush.bf16.msrb.mxu0 %v3008_v62  ;;  %v2976_v42 = vor.u32 %v3570_v38, %v2973_v40  ;;  %v3566_v62 = vld [vmem:[#allocation2 + $0x78] sm:$0xf] }
  0x75   :  { %1327 = vmatpush.bf16.msrb.mxu1 %v3136_v3  ;;  %v2960_v0 = vor.u32 %v3566_v62, %v2957_v63 }
  0x76   :  { %2065 = vmatpush.bf16.msrb.mxu2 %v3268_v50  ;;  %v3208_v50 = vor.u32 %v3632_v46, %v3207_v45 }
  0x77   :  { %527 = vmatmul.bf16.gmra.mxu0 %v3816_v34  ;;  %2094 = vmatpush.bf16.msrb.mxu3 %v3428_v56 }
  0x78   :  { %556 = vmatmul.bf16.gmra.mxu1 %v3818_v39  ;;  %1299 = vmatpush.bf16.msrb.mxu0 %v2992_v20 }
  0x79   :  { %1134 = vmatmul.bf16.gmra.mxu2 %v3816_v34  ;;  %1328 = vmatpush.bf16.msrb.mxu1 %v3120_v25 }
  0x7a   :  { %1163 = vmatmul.bf16.gmra.mxu3 %v3818_v39  ;;  %2066 = vmatpush.bf16.msrb.mxu2 %v3248_v4 }
  0x7b   :  { %2095 = vmatpush.bf16.msrb.mxu3 %v3408_v9  ;;  %v3667_v9 = vld [vmem:[#allocation2 + $0x348] sm:$0xf0] }
  0x7c   :  { %1300 = vmatpush.bf16.msrb.mxu0 %v2976_v42 }
  0x7d   :  { %1329 = vmatpush.bf16.msrb.mxu1 %v3104_v48 }
  0x7e   :  { %2067 = vmatpush.bf16.msrb.mxu2 %v3228_v26 }
  0x7f   :  { %2096 = vmatpush.bf16.msrb.mxu3 %v3388_v31 }
  0x80   :  { %1301 = vmatpush.bf16.msrb.mxu0 %v2960_v0 }
  0x82   :  { %2068 = vmatpush.bf16.msrb.mxu2 %v3208_v50  ;;  %v3335_v50 = vld [vmem:[#allocation2 + $0x2c4] sm:$0xf] }
  0x87   :  { %532 = vmatmul.bf16.gmra.mxu0 %v3836_v18 }
  0x88   :  { %561 = vmatmul.bf16.gmra.mxu1 %v3838_v19 }
  0x89   :  { %1139 = vmatmul.bf16.gmra.mxu2 %v3836_v18 }
  0x8a   :  { %1168 = vmatmul.bf16.gmra.mxu3 %v3838_v19 }
  0x97   :  { %537 = vmatmul.bf16.gmra.mxu0 %v3856_v52 }
  0x98   :  { %566 = vmatmul.bf16.gmra.mxu1 %v3858_v53 }
  0x99   :  { %1144 = vmatmul.bf16.gmra.mxu2 %v3856_v52 }
  0x9a   :  { %1173 = vmatmul.bf16.gmra.mxu3 %v3858_v53 }
  0xa4   :  { %v407_v55 = vpop.f32.mrf.mxu0 }
  0xa5   :  { %v436_v57 = vpop.f32.mrf.mxu1 }
  0xa6   :  { %v437_v58 = vadd.f32 %v436_v57, %v407_v55  ;;  %v3368_v57 = vor.u32 %v3672_v54, %v3367_v51  ;;  %v3663_v51 = vld [vmem:[#allocation2 + $0x2f0] sm:$0xf0]  ;;  %v3495_v54 = vld [vmem:[#allocation2 + $0x5c4] sm:$0xf] }
  0xa7   :  { %1187 = vmatmul.bf16.vlgmr.msra.gmra.mxu0 %v3796_v44 }
  0xa8   :  { %1216 = vmatmul.bf16.vlgmr.msra.gmra.mxu1 %v3798_v49  ;;  %2097 = vmatpush.bf16.msrb.mxu3 %v3368_v57  ;;  %v3336_v57 = vor.u32 %v3663_v51, %v3335_v50 }
  0xa9   :  { %1245 = vmatmul.bf16.vlgmr.msra.gmra.mxu2 %v3796_v44 }
  0xaa   :  { %1274 = vmatmul.bf16.vlgmr.msra.gmra.mxu3 %v3798_v49 }
  0xac   :  { %v465_v2 = vpop.f32.mrf.mxu2  ;;  %v409_v8 = vpop.f32.mrf.mxu0 }
  0xad   :  { %v494_v7 = vpop.f32.mrf.mxu3  ;;  %v438_v11 = vpop.f32.mrf.mxu1 }
  0xae   :  { %v495_v10 = vadd.f32 %v494_v7, %v465_v2  ;;  %v439_v12 = vadd.f32 %v438_v11, %v409_v8  ;;  %v3085_v2 = vld [vmem:[#allocation2 + $0x3a4] sm:$0xf0]  ;;  %v3347_v7 = vld [vmem:[#allocation2 + $0x31c] sm:$0xf]  ;;  %v3188_v8 = vor.u32 %v3627_v6, %v3187_v5 }
  0xaf   :  { %v3088_v4 = vor.u32 %v3598_v1, %v3085_v2  ;;  %v3348_v11 = vor.u32 %v3667_v9, %v3347_v7  ;;  %v3700_v1 = vld [vmem:[#allocation2 + $0x5c0] sm:$0xf]  ;;  %v3489_v2 = vld [vmem:[#allocation2 + $0x5ec] sm:$0xf0]  ;;  %v3315_v9 = vld [vmem:[#allocation2 + $0x264] sm:$0xf] }
  0xb0   :  { %v580_v13 = vrot.slane %v495_v10, 1  ;;  %2069 = vmatpush.bf16.msrb.mxu2 %v3188_v8  ;;  %v3492_v5 = vor.u32 %v3700_v1, %v3489_v2 }
  0xb1   :  { %1330 = vmatpush.bf16.msrb.mxu1 %v3088_v4  ;;  %2098 = vmatpush.bf16.msrb.mxu3 %v3348_v11  ;;  %v3475_v11 = vld [vmem:[#allocation2 + $0x564] sm:$0xf] }
  0xb2   :  { %v3884_v14 = vadd.f32 %v580_v13, %v437_v58  ;;  %v2941_v13 = vld [vmem:[#allocation2 + $0x44] sm:$0xf0] }
  0xb4   :  { %v467_v24 = vpop.f32.mrf.mxu2  ;;  %v412_v30 = vpop.f32.mrf.mxu0  ;;  %2178 = vmatpush.bf16.msra.mxu2 %v3336_v57  ;;  %v3449_v57 = vld [vmem:[#allocation2 + $0x52c] sm:$0xf0] }
  0xb5   :  { %v496_v29 = vpop.f32.mrf.mxu3  ;;  %v441_v33 = vpop.f32.mrf.mxu1 }
  0xb6   :  { %v497_v32 = vadd.f32 %v496_v29, %v467_v24  ;;  %v442_v35 = vadd.f32 %v441_v33, %v412_v30  ;;  %v3072_v24 = vor.u32 %v3594_v15, %v3069_v21 }
  0xb7   :  { %1192 = vmatmul.bf16.gmra.mxu0 %v3816_v34 }
  0xb8   :  { %v581_v36 = vrot.slane %v497_v32, 1  ;;  %1221 = vmatmul.bf16.gmra.mxu1 %v3818_v39 }
  0xb9   :  { %1250 = vmatmul.bf16.gmra.mxu2 %v3816_v34  ;;  %1331 = vmatpush.bf16.msrb.mxu1 %v3072_v24 }
  0xba   :  { %v3889_v37 = vadd.f32 %v581_v36, %v439_v12  ;;  %1279 = vmatmul.bf16.gmra.mxu3 %v3818_v39  ;;  %v3562_v12 = vld [vmem:[#allocation2 + $0x18] sm:$0xf] }
  0xbb   :  { %v2944_v20 = vor.u32 %v3562_v12, %v2941_v13 }
  0xbc   :  { %v470_v47 = vpop.f32.mrf.mxu2  ;;  %v414_v56 = vpop.f32.mrf.mxu0 }
  0xbd   :  { %v499_v55 = vpop.f32.mrf.mxu3  ;;  %v443_v59 = vpop.f32.mrf.mxu1  ;;  %1302 = vmatpush.bf16.msrb.mxu0 %v2944_v20  ;;  %2149 = vmatpush.bf16.msra.mxu1 %v3492_v5  ;;  %v3309_v20 = vld [vmem:[#allocation2 + $0x28c] sm:$0xf0]  ;;  %v3435_v5 = vld [vmem:[#allocation2 + $0x4a4] sm:$0xf] }
  0xbe   :  { %v500_v58 = vadd.f32 %v499_v55, %v470_v47  ;;  %v444_v60 = vadd.f32 %v443_v59, %v414_v56  ;;  %v3660_v59 = vld [vmem:[#allocation2 + $0x2c0] sm:$0xf] }
  0xc0   :  { %v582_v61 = vrot.slane %v500_v58, 1  ;;  %v3703_v58 = vld [vmem:[#allocation2 + $0x5f0] sm:$0xf0] }
  0xc1   :  { %v3496_v63 = vor.u32 %v3703_v58, %v3495_v54 }
  0xc2   :  { %v3892_v3 = vadd.f32 %v582_v61, %v442_v35 }
  0xc3   :  { %2207 = vmatpush.bf16.msra.mxu3 %v3496_v63  ;;  %v3275_v63 = vld [vmem:[#allocation2 + $0x1a4] sm:$0xf] }
  0xc4   :  { %v472_v10 = vpop.f32.mrf.mxu2  ;;  %v417_v17 = vpop.f32.mrf.mxu0 }
  0xc5   :  { %v501_v16 = vpop.f32.mrf.mxu3  ;;  %v446_v23 = vpop.f32.mrf.mxu1 }
  0xc6   :  { %v502_v22 = vadd.f32 %v501_v16, %v472_v10  ;;  %v447_v25 = vadd.f32 %v446_v23, %v417_v17  ;;  %v3658_v10 = vld [vmem:[#allocation2 + $0x290] sm:$0xf0]  ;;  %v3655_v17 = vld [vmem:[#allocation2 + $0x260] sm:$0xf] }
  0xc7   :  { %1197 = vmatmul.bf16.gmra.mxu0 %v3836_v18  ;;  %v3316_v15 = vor.u32 %v3658_v10, %v3315_v9  ;;  %v3698_v16 = vld [vmem:[#allocation2 + $0x590] sm:$0xf0]  ;;  %v3312_v24 = vor.u32 %v3655_v17, %v3309_v20  ;;  %v3255_v20 = vld [vmem:[#allocation2 + $0x144] sm:$0xf] }
  0xc8   :  { %v583_v26 = vrot.slane %v502_v22, 1  ;;  %1226 = vmatmul.bf16.gmra.mxu1 %v3838_v19  ;;  %v3476_v23 = vor.u32 %v3698_v16, %v3475_v11  ;;  %v3645_v11 = vld [vmem:[#allocation2 + $0x1a0] sm:$0xf] }
  0xc9   :  { %1255 = vmatmul.bf16.gmra.mxu2 %v3836_v18 }
  0xca   :  { %v3897_v27 = vadd.f32 %v583_v26, %v444_v60  ;;  %1284 = vmatmul.bf16.gmra.mxu3 %v3838_v19  ;;  %v3329_v60 = vld [vmem:[#allocation2 + $0x2ec] sm:$0xf0]  ;;  %2179 = vmatpush.bf16.msra.mxu2 %v3316_v15 }
  0xcb   :  { %v3332_v0 = vor.u32 %v3660_v59, %v3329_v60  ;;  %v3469_v26 = vld [vmem:[#allocation2 + $0x58c] sm:$0xf0]  ;;  %2208 = vmatpush.bf16.msra.mxu3 %v3476_v23 }
  0xcc   :  { %v475_v28 = vpop.f32.mrf.mxu2  ;;  %v419_v30 = vpop.f32.mrf.mxu0 }
  0xcd   :  { %v504_v29 = vpop.f32.mrf.mxu3  ;;  %v448_v32 = vpop.f32.mrf.mxu1  ;;  %2120 = vmatpush.bf16.msra.mxu0 %v3332_v0  ;;  %v3648_v0 = vld [vmem:[#allocation2 + $0x1d0] sm:$0xf0] }
  0xce   :  { %v505_v31 = vadd.f32 %v504_v29, %v475_v28  ;;  %v449_v33 = vadd.f32 %v448_v32, %v419_v30 }
  0xd0   :  { %v584_v35 = vrot.slane %v505_v31, 1 }
  0xd1   :  { %2121 = vmatpush.bf16.msra.mxu0 %v3312_v24  ;;  %v3415_v24 = vld [vmem:[#allocation2 + $0x444] sm:$0xf] }
  0xd2   :  { %v3900_v36 = vadd.f32 %v584_v35, %v447_v25  ;;  %v3695_v25 = vld [vmem:[#allocation2 + $0x560] sm:$0xf] }
  0xd3   :  { %v3472_v29 = vor.u32 %v3695_v25, %v3469_v26  ;;  %v3683_v25 = vld [vmem:[#allocation2 + $0x470] sm:$0xf0] }
  0xd4   :  { %v477_v38 = vpop.f32.mrf.mxu2  ;;  %v422_v41 = vpop.f32.mrf.mxu0  ;;  %v3416_v26 = vor.u32 %v3683_v25, %v3415_v24  ;;  %v3355_v25 = vld [vmem:[#allocation2 + $0x324] sm:$0xf] }
  0xd5   :  { %v506_v40 = vpop.f32.mrf.mxu3  ;;  %v451_v43 = vpop.f32.mrf.mxu1  ;;  %2150 = vmatpush.bf16.msra.mxu1 %v3472_v29  ;;  %v3249_v29 = vld [vmem:[#allocation2 + $0x16c] sm:$0xf0] }
  0xd6   :  { %v507_v42 = vadd.f32 %v506_v40, %v477_v38  ;;  %v452_v45 = vadd.f32 %v451_v43, %v422_v41  ;;  %v3295_v38 = vld [vmem:[#allocation2 + $0x204] sm:$0xf]  ;;  %v3653_v40 = vld [vmem:[#allocation2 + $0x230] sm:$0xf0] }
  0xd7   :  { %1202 = vmatmul.bf16.gmra.mxu0 %v3856_v52  ;;  %v3455_v41 = vld [vmem:[#allocation2 + $0x504] sm:$0xf] }
  0xd8   :  { %v585_v46 = vrot.slane %v507_v42, 1  ;;  %1231 = vmatmul.bf16.gmra.mxu1 %v3858_v53 }
  0xd9   :  { %1260 = vmatmul.bf16.gmra.mxu2 %v3856_v52 }
  0xda   :  { %v3905_v47 = vadd.f32 %v585_v46, %v449_v33  ;;  %1289 = vmatmul.bf16.gmra.mxu3 %v3858_v53  ;;  %v3693_v46 = vld [vmem:[#allocation2 + $0x530] sm:$0xf0] }
  0xdb   :  { %v3456_v54 = vor.u32 %v3693_v46, %v3455_v41 }
  0xdc   :  { %v480_v48 = vpop.f32.mrf.mxu2  ;;  %v424_v56 = vpop.f32.mrf.mxu0 }
  0xdd   :  { %v509_v55 = vpop.f32.mrf.mxu3  ;;  %v453_v62 = vpop.f32.mrf.mxu1  ;;  %2209 = vmatpush.bf16.msra.mxu3 %v3456_v54  ;;  %v3678_v54 = vld [vmem:[#allocation2 + $0x410] sm:$0xf0] }
  0xde   :  { %v510_v61 = vadd.f32 %v509_v55, %v480_v48  ;;  %v454_v4 = vadd.f32 %v453_v62, %v424_v56  ;;  %v3650_v48 = vld [vmem:[#allocation2 + $0x200] sm:$0xf]  ;;  %v3289_v55 = vld [vmem:[#allocation2 + $0x22c] sm:$0xf0] }
  0xdf   :  { %v3690_v56 = vld [vmem:[#allocation2 + $0x500] sm:$0xf] }
  0xe0   :  { %v586_v6 = vrot.slane %v510_v61, 1  ;;  %v3452_v59 = vor.u32 %v3690_v56, %v3449_v57  ;;  %v3635_v57 = vld [vmem:[#allocation2 + $0xe0] sm:$0xf] }
  0xe2   :  { %v3908_v7 = vadd.f32 %v586_v6, %v452_v45  ;;  %v3296_v45 = vor.u32 %v3653_v40, %v3295_v38  ;;  %2151 = vmatpush.bf16.msra.mxu1 %v3452_v59  ;;  %v3688_v6 = vld [vmem:[#allocation2 + $0x4d0] sm:$0xf0]  ;;  %v3409_v38 = vld [vmem:[#allocation2 + $0x46c] sm:$0xf0] }
  0xe3   :  { %v3436_v10 = vor.u32 %v3688_v6, %v3435_v5  ;;  %v3375_v5 = vld [vmem:[#allocation2 + $0x384] sm:$0xf]  ;;  %v3673_v6 = vld [vmem:[#allocation2 + $0x3b0] sm:$0xf0] }
  0xe4   :  { %v482_v8 = vpop.f32.mrf.mxu2  ;;  %v523_v13 = vpop.f32.mrf.mxu0  ;;  %2180 = vmatpush.bf16.msra.mxu2 %v3296_v45 }
  0xe5   :  { %v511_v12 = vpop.f32.mrf.mxu3  ;;  %v552_v22 = vpop.f32.mrf.mxu1  ;;  %2210 = vmatpush.bf16.msra.mxu3 %v3436_v10  ;;  %v3630_v10 = vld [vmem:[#allocation2 + $0x80] sm:$0xf] }
  0xe6   :  { %v512_v21 = vadd.f32 %v511_v12, %v482_v8  ;;  %v553_v28 = vadd.f32 %v552_v22, %v523_v13  ;;  %v3269_v12 = vld [vmem:[#allocation2 + $0x1cc] sm:$0xf0]  ;;  %v3685_v13 = vld [vmem:[#allocation2 + $0x4a0] sm:$0xf] }
  0xe7   :  { %1303 = vmatmul.bf16.vlgmr.msrb.gmra.mxu0 %v3796_v44  ;;  %v3272_v16 = vor.u32 %v3645_v11, %v3269_v12  ;;  %v3209_v11 = vld [vmem:[#allocation2 + $0xac] sm:$0xf0]  ;;  %v3670_v12 = vld [vmem:[#allocation2 + $0x380] sm:$0xf] }
  0xe8   :  { %v587_v30 = vrot.slane %v512_v21, 1  ;;  %v612_v31 = vrot.slane %v553_v28, 2  ;;  %1332 = vmatmul.bf16.vlgmr.msrb.gmra.mxu1 %v3798_v49  ;;  %v3643_v21 = vld [vmem:[#allocation2 + $0x170] sm:$0xf0]  ;;  %v3640_v28 = vld [vmem:[#allocation2 + $0x140] sm:$0xf] }
  0xe9   :  { %2070 = vmatmul.bf16.vlgmr.msrb.gmra.mxu2 %v3796_v44  ;;  %v3256_v23 = vor.u32 %v3643_v21, %v3255_v20  ;;  %2211 = vmatpush.bf16.msra.mxu3 %v3416_v26  ;;  %v3195_v20 = vld [vmem:[#allocation2 + $0x24] sm:$0xf]  ;;  %v3628_v21 = vld [vmem:[#allocation2 + $0x50] sm:$0xf0] }
  0xea   :  { %v3913_v32 = vadd.f32 %v587_v30, %v454_v4  ;;  %2099 = vmatmul.bf16.vlgmr.msrb.gmra.mxu3 %v3798_v49  ;;  %v3917_v33 = vadd.f32 %v612_v31, %v3884_v14  ;;  %v3292_v14 = vor.u32 %v3650_v48, %v3289_v55  ;;  %v3276_v4 = vor.u32 %v3648_v0, %v3275_v63  ;;  %v3680_v30 = vld [vmem:[#allocation2 + $0x440] sm:$0xf]  ;;  %v3215_v0 = vld [vmem:[#allocation2 + $0x84] sm:$0xf]  ;;  %v3668_v26 = vld [vmem:[#allocation2 + $0x350] sm:$0xf0] }
  0xeb   :  { %v3412_v41 = vor.u32 %v3680_v30, %v3409_v38  ;;  %v3196_v24 = vor.u32 %v3628_v21, %v3195_v20  ;;  %v3625_v30 = vld [vmem:[#allocation2 + $0x20] sm:$0xf] }
  0xec   :  { %v1130_v35 = vpop.f32.mrf.mxu2  ;;  %v525_v43 = vpop.f32.mrf.mxu0  ;;  %2122 = vmatpush.bf16.msra.mxu0 %v3292_v14  ;;  %2181 = vmatpush.bf16.msra.mxu2 %v3276_v4  ;;  %v3675_v14 = vld [vmem:[#allocation2 + $0x3e0] sm:$0xf] }
  0xed   :  { %v1159_v42 = vpop.f32.mrf.mxu3  ;;  %v554_v51 = vpop.f32.mrf.mxu1  ;;  %v3665_v38 = vld [vmem:[#allocation2 + $0x320] sm:$0xf] }
  0xee   :  { %v3919_v50 = vadd.f32 %v1159_v42, %v1130_v35  ;;  %v555_v58 = vadd.f32 %v554_v51, %v525_v43  ;;  %v3252_v35 = vor.u32 %v3640_v28, %v3249_v29  ;;  %v3235_v42 = vld [vmem:[#allocation2 + $0xe4] sm:$0xf]  ;;  %v3638_v43 = vld [vmem:[#allocation2 + $0x110] sm:$0xf0] }
  0xef   :  { %v3236_v48 = vor.u32 %v3638_v43, %v3235_v42  ;;  %v3395_v51 = vld [vmem:[#allocation2 + $0x3e4] sm:$0xf]  ;;  %v3349_v42 = vld [vmem:[#allocation2 + $0x34c] sm:$0xf0] }
  0xf0   :  { %v613_v60 = vrot.slane %v555_v58, 2  ;;  %2123 = vmatpush.bf16.msra.mxu0 %v3272_v16  ;;  %2182 = vmatpush.bf16.msra.mxu2 %v3256_v23  ;;  %v3229_v58 = vld [vmem:[#allocation2 + $0x10c] sm:$0xf0]  ;;  %v3352_v43 = vor.u32 %v3665_v38, %v3349_v42  ;;  %v3303_v38 = vld [vmem:[#allocation2 + $0x20c] sm:$0xf] }
  0xf1   :  { %v3369_v16 = vld [vmem:[#allocation2 + $0x3ac] sm:$0xf0] }
  0xf2   :  { %v3922_v61 = vadd.f32 %v613_v60, %v3889_v37  ;;  %v3429_v37 = vld [vmem:[#allocation2 + $0x4cc] sm:$0xf0]  ;;  %v3232_v60 = vor.u32 %v3635_v57, %v3229_v58  ;;  %v3343_v58 = vld [vmem:[#allocation2 + $0x2cc] sm:$0xf] }
  0xf3   :  { %v3432_v17 = vor.u32 %v3685_v13, %v3429_v37 }
  0xf4   :  { %v1132_v62 = vpop.f32.mrf.mxu2  ;;  %v528_v2 = vpop.f32.mrf.mxu0  ;;  %2124 = vmatpush.bf16.msra.mxu0 %v3252_v35  ;;  %2183 = vmatpush.bf16.msra.mxu2 %v3236_v48  ;;  %v3189_v35 = vld [vmem:[#allocation2 + $0x4c] sm:$0xf0] }
  0xf5   :  { %v1161_v1 = vpop.f32.mrf.mxu3  ;;  %v557_v9 = vpop.f32.mrf.mxu1  ;;  %2152 = vmatpush.bf16.msra.mxu1 %v3432_v17  ;;  %v3372_v17 = vor.u32 %v3670_v12, %v3369_v16  ;;  %v3699_v16 = vld [vmem:[#allocation2 + $0x598] sm:$0xf0] }
  0xf6   :  { %v3924_v8 = vadd.f32 %v1161_v1, %v1132_v62  ;;  %v558_v15 = vadd.f32 %v557_v9, %v528_v2  ;;  %v3389_v62 = vld [vmem:[#allocation2 + $0x40c] sm:$0xf0]  ;;  %v3633_v1 = vld [vmem:[#allocation2 + $0xb0] sm:$0xf0]  ;;  %v3376_v9 = vor.u32 %v3673_v6, %v3375_v5  ;;  %v3497_v6 = vld [vmem:[#allocation2 + $0x5f4] sm:$0xf0] }
  0xf7   :  { %1308 = vmatmul.bf16.gmra.mxu0 %v3816_v34  ;;  %v3392_v63 = vor.u32 %v3675_v14, %v3389_v62  ;;  %v3216_v4 = vor.u32 %v3633_v1, %v3215_v0  ;;  %v3664_v14 = vld [vmem:[#allocation2 + $0x2f8] sm:$0xf0]  ;;  %v3503_v62 = vld [vmem:[#allocation2 + $0x5cc] sm:$0xf]  ;;  %v3661_v1 = vld [vmem:[#allocation2 + $0x2c8] sm:$0xf] }
  0xf8   :  { %v614_v22 = vrot.slane %v558_v15, 2  ;;  %1337 = vmatmul.bf16.gmra.mxu1 %v3818_v39  ;;  %2125 = vmatpush.bf16.msra.mxu0 %v3232_v60  ;;  %v3212_v15 = vor.u32 %v3630_v10, %v3209_v11  ;;  %v3344_v60 = vor.u32 %v3664_v14, %v3343_v58  ;;  %v3659_v10 = vld [vmem:[#allocation2 + $0x298] sm:$0xf0] }
  0xf9   :  { %2075 = vmatmul.bf16.gmra.mxu2 %v3816_v34  ;;  %2153 = vmatpush.bf16.msra.mxu1 %v3412_v41  ;;  %v3192_v41 = vor.u32 %v3625_v30, %v3189_v35  ;;  %v3477_v35 = vld [vmem:[#allocation2 + $0x594] sm:$0xf0] }
  0xfa   :  { %2104 = vmatmul.bf16.gmra.mxu3 %v3818_v39  ;;  %v3931_v31 = vadd.f32 %v614_v22, %v3892_v3  ;;  %v3396_v3 = vor.u32 %v3678_v54, %v3395_v51  ;;  %2184 = vmatpush.bf16.msra.mxu2 %v3216_v4  ;;  %v3701_v4 = vld [vmem:[#allocation2 + $0x5c8] sm:$0xf] }
  0xfb   :  { %v3500_v12 = vor.u32 %v3701_v4, %v3497_v6  ;;  %v3649_v4 = vld [vmem:[#allocation2 + $0x1d8] sm:$0xf0] }
  0xfc   :  { %v1135_v40 = vpop.f32.mrf.mxu2  ;;  %v530_v46 = vpop.f32.mrf.mxu0  ;;  %2212 = vmatpush.bf16.msra.mxu3 %v3396_v3  ;;  %2126 = vmatpush.bf16.msra.mxu0 %v3212_v15  ;;  %v3483_v15 = vld [vmem:[#allocation2 + $0x56c] sm:$0xf] }
  0xfd   :  { %v1164_v45 = vpop.f32.mrf.mxu3  ;;  %v559_v56 = vpop.f32.mrf.mxu1  ;;  %2154 = vmatpush.bf16.msra.mxu1 %v3392_v63  ;;  %v3704_v63 = vld [vmem:[#allocation2 + $0x5f8] sm:$0xf0]  ;;  %v3484_v21 = vor.u32 %v3699_v16, %v3483_v15 }
  0xfe   :  { %v3933_v55 = vadd.f32 %v1164_v45, %v1135_v40  ;;  %v560_v59 = vadd.f32 %v559_v56, %v530_v46  ;;  %2185 = vmatpush.bf16.msra.mxu2 %v3196_v24  ;;  %v3504_v0 = vor.u32 %v3704_v63, %v3503_v62  ;;  %v3691_v62 = vld [vmem:[#allocation2 + $0x508] sm:$0xf] }
 0x100   :  { %v615_v2 = vrot.slane %v560_v59, 2  ;;  %2213 = vmatpush.bf16.msra.mxu3 %v3376_v9  ;;  %2127 = vmatpush.bf16.msra.mxu0 %v3192_v41  ;;  %v3323_v9 = vld [vmem:[#allocation2 + $0x26c] sm:$0xf] }
 0x101   :  { %2155 = vmatpush.bf16.msra.mxu1 %v3372_v17  ;;  %v3324_v20 = vor.u32 %v3659_v10, %v3323_v9  ;;  %v3443_v10 = vld [vmem:[#allocation2 + $0x4ac] sm:$0xf] }
 0x102   :  { %v3936_v13 = vadd.f32 %v615_v2, %v3897_v27  ;;  %v3356_v27 = vor.u32 %v3668_v26, %v3355_v25  ;;  %v3337_v2 = vld [vmem:[#allocation2 + $0x2f4] sm:$0xf0]  ;;  %2294 = vmatpush.bf16.msrb.mxu2 %v3344_v60  ;;  %v3656_v25 = vld [vmem:[#allocation2 + $0x268] sm:$0xf] }
 0x103   :  { %v3340_v5 = vor.u32 %v3661_v1, %v3337_v2  ;;  %v3317_v26 = vld [vmem:[#allocation2 + $0x294] sm:$0xf0]  ;;  %v3283_v2 = vld [vmem:[#allocation2 + $0x1ac] sm:$0xf] }
 0x104   :  { %v1137_v37 = vpop.f32.mrf.mxu2  ;;  %v533_v23 = vpop.f32.mrf.mxu0  ;;  %2214 = vmatpush.bf16.msra.mxu3 %v3356_v27  ;;  %v3320_v30 = vor.u32 %v3656_v25, %v3317_v26  ;;  %v3297_v60 = vld [vmem:[#allocation2 + $0x234] sm:$0xf0]  ;;  %v3284_v9 = vor.u32 %v3649_v4, %v3283_v2  ;;  %v3243_v2 = vld [vmem:[#allocation2 + $0xec] sm:$0xf]  ;;  %v3639_v4 = vld [vmem:[#allocation2 + $0x118] sm:$0xf0] }
 0x105   :  { %v1166_v22 = vpop.f32.mrf.mxu3  ;;  %v562_v29 = vpop.f32.mrf.mxu1  ;;  %2156 = vmatpush.bf16.msra.mxu1 %v3352_v43  ;;  %2236 = vmatpush.bf16.msrb.mxu0 %v3340_v5  ;;  %v3463_v43 = vld [vmem:[#allocation2 + $0x50c] sm:$0xf]  ;;  %v3457_v1 = vld [vmem:[#allocation2 + $0x534] sm:$0xf0] }
 0x106   :  { %v3938_v28 = vadd.f32 %v1166_v22, %v1137_v37  ;;  %v563_v40 = vadd.f32 %v562_v29, %v533_v23  ;;  %2295 = vmatpush.bf16.msrb.mxu2 %v3324_v20  ;;  %v3696_v29 = vld [vmem:[#allocation2 + $0x568] sm:$0xf]  ;;  %v3460_v6 = vor.u32 %v3691_v62, %v3457_v1  ;;  %v3437_v26 = vld [vmem:[#allocation2 + $0x4d4] sm:$0xf0] }
 0x107   :  { %1313 = vmatmul.bf16.gmra.mxu0 %v3836_v18  ;;  %v3480_v42 = vor.u32 %v3696_v29, %v3477_v35  ;;  %v3263_v29 = vld [vmem:[#allocation2 + $0x14c] sm:$0xf]  ;;  %v3417_v1 = vld [vmem:[#allocation2 + $0x474] sm:$0xf0] }
 0x108   :  { %v616_v45 = vrot.slane %v563_v40, 2  ;;  %1342 = vmatmul.bf16.gmra.mxu1 %v3838_v19  ;;  %2323 = vmatpush.bf16.msrb.mxu3 %v3504_v0  ;;  %v3654_v40 = vld [vmem:[#allocation2 + $0x238] sm:$0xf0] }
 0x109   :  { %2080 = vmatmul.bf16.gmra.mxu2 %v3836_v18  ;;  %2265 = vmatpush.bf16.msrb.mxu1 %v3500_v12 }
 0x10a   :  { %2109 = vmatmul.bf16.gmra.mxu3 %v3838_v19  ;;  %v3945_v46 = vadd.f32 %v616_v45, %v3900_v36  ;;  %v3694_v45 = vld [vmem:[#allocation2 + $0x538] sm:$0xf0]  ;;  %2237 = vmatpush.bf16.msrb.mxu0 %v3320_v30 }
 0x10b   :  { %v3644_v30 = vld [vmem:[#allocation2 + $0x178] sm:$0xf0] }
 0x10c   :  { %v1140_v48 = vpop.f32.mrf.mxu2  ;;  %v535_v54 = vpop.f32.mrf.mxu0  ;;  %2324 = vmatpush.bf16.msrb.mxu3 %v3484_v21  ;;  %v3646_v21 = vld [vmem:[#allocation2 + $0x1a8] sm:$0xf] }
 0x10d   :  { %v1169_v51 = vpop.f32.mrf.mxu3  ;;  %v564_v3 = vpop.f32.mrf.mxu1  ;;  %2266 = vmatpush.bf16.msrb.mxu1 %v3480_v42  ;;  %v3684_v42 = vld [vmem:[#allocation2 + $0x478] sm:$0xf0] }
 0x10e   :  { %v3947_v56 = vadd.f32 %v1169_v51, %v1140_v48  ;;  %v565_v57 = vadd.f32 %v564_v3, %v535_v54  ;;  %v3304_v54 = vor.u32 %v3654_v40, %v3303_v38  ;;  %v3464_v3 = vor.u32 %v3694_v45, %v3463_v43 }
 0x10f   :  { %v3264_v40 = vor.u32 %v3644_v30, %v3263_v29  ;;  %v3397_v30 = vld [vmem:[#allocation2 + $0x414] sm:$0xf0] }
 0x110   :  { %v617_v59 = vrot.slane %v565_v57, 2  ;;  %2296 = vmatpush.bf16.msrb.mxu2 %v3304_v54  ;;  %2325 = vmatpush.bf16.msrb.mxu3 %v3464_v3 }
 0x111   :  { %2267 = vmatpush.bf16.msrb.mxu1 %v3460_v6 }
 0x112   :  { %v3950_v36 = vadd.f32 %v617_v59, %v3905_v47  ;;  %v3651_v59 = vld [vmem:[#allocation2 + $0x208] sm:$0xf] }
 0x113   :  { %v3300_v0 = vor.u32 %v3651_v59, %v3297_v60  ;;  %v3257_v59 = vld [vmem:[#allocation2 + $0x174] sm:$0xf0]  ;;  %v3681_v60 = vld [vmem:[#allocation2 + $0x448] sm:$0xf] }
 0x114   :  { %v1142_v11 = vpop.f32.mrf.mxu2  ;;  %v538_v17 = vpop.f32.mrf.mxu0  ;;  %2297 = vmatpush.bf16.msrb.mxu2 %v3284_v9  ;;  %v3420_v6 = vor.u32 %v3681_v60, %v3417_v1  ;;  %v3244_v9 = vor.u32 %v3639_v4, %v3243_v2  ;;  %v3377_v1 = vld [vmem:[#allocation2 + $0x3b4] sm:$0xf0] }
 0x115   :  { %v1171_v37 = vpop.f32.mrf.mxu3  ;;  %v567_v23 = vpop.f32.mrf.mxu1  ;;  %2238 = vmatpush.bf16.msrb.mxu0 %v3300_v0 }
 0x116   :  { %v3952_v22 = vadd.f32 %v1171_v37, %v1142_v11  ;;  %v568_v47 = vadd.f32 %v567_v23, %v538_v17  ;;  %v3689_v11 = vld [vmem:[#allocation2 + $0x4d8] sm:$0xf0]  ;;  %v3277_v23 = vld [vmem:[#allocation2 + $0x1d4] sm:$0xf0] }
 0x117   :  { %1318 = vmatmul.bf16.gmra.mxu0 %v3856_v52  ;;  %v3444_v16 = vor.u32 %v3689_v11, %v3443_v10  ;;  %v3280_v25 = vor.u32 %v3646_v21, %v3277_v23  ;;  %v3403_v10 = vld [vmem:[#allocation2 + $0x3ec] sm:$0xf]  ;;  %v3679_v11 = vld [vmem:[#allocation2 + $0x418] sm:$0xf0] }
 0x118   :  { %v618_v24 = vrot.slane %v568_v47, 2  ;;  %1347 = vmatmul.bf16.gmra.mxu1 %v3858_v53  ;;  %v3686_v47 = vld [vmem:[#allocation2 + $0x4a8] sm:$0xf]  ;;  %2298 = vmatpush.bf16.msrb.mxu2 %v3264_v40 }
 0x119   :  { %2085 = vmatmul.bf16.gmra.mxu2 %v3856_v52  ;;  %2326 = vmatpush.bf16.msrb.mxu3 %v3444_v16  ;;  %v3440_v38 = vor.u32 %v3686_v47, %v3437_v26  ;;  %v3404_v16 = vor.u32 %v3679_v11, %v3403_v10  ;;  %v3636_v47 = vld [vmem:[#allocation2 + $0xe8] sm:$0xf]  ;;  %v3363_v10 = vld [vmem:[#allocation2 + $0x32c] sm:$0xf] }
 0x11a   :  { %2114 = vmatmul.bf16.gmra.mxu3 %v3858_v53  ;;  %v3959_v27 = vadd.f32 %v618_v24, %v3908_v7  ;;  %2239 = vmatpush.bf16.msrb.mxu0 %v3280_v25  ;;  %v3676_v25 = vld [vmem:[#allocation2 + $0x3e8] sm:$0xf] }
 0x11b   :  { %2268 = vmatpush.bf16.msrb.mxu1 %v3440_v38  ;;  %v3634_v38 = vld [vmem:[#allocation2 + $0xb8] sm:$0xf0] }
 0x11c   :  { %v1145_v41 = vpop.f32.mrf.mxu2  ;;  %v540_v51 = vpop.f32.mrf.mxu0  ;;  %2299 = vmatpush.bf16.msrb.mxu2 %v3244_v9  ;;  %v3629_v9 = vld [vmem:[#allocation2 + $0x58] sm:$0xf0] }
 0x11d   :  { %v1174_v48 = vpop.f32.mrf.mxu3  ;;  %v569_v58 = vpop.f32.mrf.mxu1 }
 0x11e   :  { %v3961_v57 = vadd.f32 %v1174_v48, %v1145_v41  ;;  %v570_v14 = vadd.f32 %v569_v58, %v540_v51  ;;  %v3423_v41 = vld [vmem:[#allocation2 + $0x44c] sm:$0xf] }
 0x11f   :  { %v3424_v48 = vor.u32 %v3684_v42, %v3423_v41  ;;  %2269 = vmatpush.bf16.msrb.mxu1 %v3420_v6  ;;  %v3400_v41 = vor.u32 %v3676_v25, %v3397_v30  ;;  %v3203_v6 = vld [vmem:[#allocation2 + $0x2c] sm:$0xf] }
 0x120   :  { %v619_v7 = vrot.slane %v570_v14, 2 }
 0x121   :  { %2327 = vmatpush.bf16.msrb.mxu3 %v3424_v48 }
 0x122   :  { %v3964_v63 = vadd.f32 %v619_v7, %v3913_v32  ;;  %v3641_v7 = vld [vmem:[#allocation2 + $0x148] sm:$0xf] }
 0x123   :  { %v3260_v0 = vor.u32 %v3641_v7, %v3257_v59  ;;  %2270 = vmatpush.bf16.msrb.mxu1 %v3400_v41  ;;  %v3631_v7 = vld [vmem:[#allocation2 + $0x88] sm:$0xf]  ;;  %v3217_v59 = vld [vmem:[#allocation2 + $0xb4] sm:$0xf0] }
 0x124   :  { %v1147_v5 = vpop.f32.mrf.mxu2  ;;  %v1188_v15 = vpop.f32.mrf.mxu0 }
 0x125   :  { %v1176_v12 = vpop.f32.mrf.mxu3  ;;  %v1217_v17 = vpop.f32.mrf.mxu1  ;;  %2240 = vmatpush.bf16.msrb.mxu0 %v3260_v0  ;;  %2328 = vmatpush.bf16.msrb.mxu3 %v3404_v16  ;;  %v3671_v0 = vld [vmem:[#allocation2 + $0x388] sm:$0xf] }
 0x126   :  { %v3966_v37 = vadd.f32 %v1176_v12, %v1147_v5  ;;  %v1218_v32 = vadd.f32 %v1217_v17, %v1188_v15  ;;  %v3380_v4 = vor.u32 %v3671_v0, %v3377_v1  ;;  %v3626_v16 = vld [vmem:[#allocation2 + $0x28] sm:$0xf] }
 0x127   :  { %2128 = vmatmul.bf16.vlgmr.msra.gmra.mxu0 %v3796_v44 }
 0x128   :  { %v1361_v20 = vrot.slane %v1218_v32, 1  ;;  %2157 = vmatmul.bf16.vlgmr.msra.gmra.mxu1 %v3798_v49 }
 0x129   :  { %2186 = vmatmul.bf16.vlgmr.msra.gmra.mxu2 %v3796_v44  ;;  %2271 = vmatpush.bf16.msrb.mxu1 %v3380_v4 }
 0x12a   :  { %2215 = vmatmul.bf16.vlgmr.msra.gmra.mxu3 %v3798_v49  ;;  %v1377_v24 = vadd.f32 %v1361_v20, %v3919_v50 }
 0x12c   :  { %v1246_v35 = vpop.f32.mrf.mxu2  ;;  %v1190_v45 = vpop.f32.mrf.mxu0 }
 0x12d   :  { %v1275_v43 = vpop.f32.mrf.mxu3  ;;  %v1219_v54 = vpop.f32.mrf.mxu1 }
 0x12e   :  { %v1276_v51 = vadd.f32 %v1275_v43, %v1246_v35  ;;  %v1220_v3 = vadd.f32 %v1219_v54, %v1190_v45  ;;  %v3223_v35 = vld [vmem:[#allocation2 + $0x8c] sm:$0xf]  ;;  %v3674_v45 = vld [vmem:[#allocation2 + $0x3b8] sm:$0xf0] }
 0x12f   :  { %v3224_v42 = vor.u32 %v3634_v38, %v3223_v35  ;;  %v3383_v43 = vld [vmem:[#allocation2 + $0x38c] sm:$0xf] }
 0x130   :  { %v1393_v50 = vrot.slane %v1276_v51, 2  ;;  %v1362_v58 = vrot.slane %v1220_v3, 1  ;;  %v3384_v54 = vor.u32 %v3674_v45, %v3383_v43 }
 0x131   :  { %2300 = vmatpush.bf16.msrb.mxu2 %v3224_v42 }
 0x132   :  { %v3973_v14 = vadd.f32 %v1393_v50, %v1377_v24  ;;  %v1378_v62 = vadd.f32 %v1362_v58, %v3924_v8  ;;  %v3237_v24 = vld [vmem:[#allocation2 + $0x114] sm:$0xf0]  ;;  %2329 = vmatpush.bf16.msrb.mxu3 %v3384_v54 }
 0x133   :  { %v3240_v29 = vor.u32 %v3636_v47, %v3237_v24  ;;  %v3666_v47 = vld [vmem:[#allocation2 + $0x328] sm:$0xf]  ;;  %v3357_v24 = vld [vmem:[#allocation2 + $0x354] sm:$0xf0] }
 0x134   :  { %v1248_v5 = vpop.f32.mrf.mxu2  ;;  %v1193_v15 = vpop.f32.mrf.mxu0 }
 0x135   :  { %v1277_v12 = vpop.f32.mrf.mxu3  ;;  %v1222_v32 = vpop.f32.mrf.mxu1  ;;  %2241 = vmatpush.bf16.msrb.mxu0 %v3240_v29 }
 0x136   :  { %v1278_v17 = vadd.f32 %v1277_v12, %v1248_v5  ;;  %v1223_v20 = vadd.f32 %v1222_v32, %v1193_v15  ;;  %v3204_v12 = vor.u32 %v3629_v9, %v3203_v6  ;;  %v3669_v15 = vld [vmem:[#allocation2 + $0x358] sm:$0xf0] }
 0x137   :  { %2133 = vmatmul.bf16.gmra.mxu0 %v3816_v34 }
 0x138   :  { %v1394_v8 = vrot.slane %v1278_v17, 2  ;;  %v1363_v21 = vrot.slane %v1223_v20, 1  ;;  %2162 = vmatmul.bf16.gmra.mxu1 %v3818_v39  ;;  %v3197_v17 = vld [vmem:[#allocation2 + $0x54] sm:$0xf0]  ;;  %2301 = vmatpush.bf16.msrb.mxu2 %v3204_v12 }
 0x139   :  { %2191 = vmatmul.bf16.gmra.mxu2 %v3816_v34 }
 0x13a   :  { %v3979_v23 = vadd.f32 %v1394_v8, %v1378_v62  ;;  %2220 = vmatmul.bf16.gmra.mxu3 %v3818_v39  ;;  %v1379_v26 = vadd.f32 %v1363_v21, %v3933_v55  ;;  %v3220_v62 = vor.u32 %v3631_v7, %v3217_v59  ;;  %v3364_v8 = vor.u32 %v3669_v15, %v3363_v10 }
 0x13b   :  { %v3200_v21 = vor.u32 %v3626_v16, %v3197_v17 }
 0x13c   :  { %v1251_v40 = vpop.f32.mrf.mxu2  ;;  %v1195_v51 = vpop.f32.mrf.mxu0  ;;  %2242 = vmatpush.bf16.msrb.mxu0 %v3220_v62  ;;  %2330 = vmatpush.bf16.msrb.mxu3 %v3364_v8 }
 0x13d   :  { %v1280_v48 = vpop.f32.mrf.mxu3  ;;  %v1224_v50 = vpop.f32.mrf.mxu1 }
 0x13e   :  { %v1281_v3 = vadd.f32 %v1280_v48, %v1251_v40  ;;  %v1225_v58 = vadd.f32 %v1224_v50, %v1195_v51 }
 0x140   :  { %v1395_v55 = vrot.slane %v1281_v3, 2  ;;  %v1364_v60 = vrot.slane %v1225_v58, 1  ;;  %2243 = vmatpush.bf16.msrb.mxu0 %v3200_v21 }
 0x142   :  { %v3983_v2 = vadd.f32 %v1395_v55, %v1379_v26  ;;  %v1380_v5 = vadd.f32 %v1364_v60, %v3938_v28  ;;  %v3360_v28 = vor.u32 %v3666_v47, %v3357_v24 }
 0x144   :  { %v1253_v11 = vpop.f32.mrf.mxu2  ;;  %v1198_v20 = vpop.f32.mrf.mxu0  ;;  %2272 = vmatpush.bf16.msrb.mxu1 %v3360_v28 }
 0x145   :  { %v1282_v32 = vpop.f32.mrf.mxu3  ;;  %v1227_v26 = vpop.f32.mrf.mxu1 }
 0x146   :  { %v1283_v25 = vadd.f32 %v1282_v32, %v1253_v11  ;;  %v1228_v29 = vadd.f32 %v1227_v26, %v1198_v20 }
 0x147   :  { %2138 = vmatmul.bf16.gmra.mxu0 %v3836_v18 }
 0x148   :  { %v1396_v30 = vrot.slane %v1283_v25, 2  ;;  %v1365_v35 = vrot.slane %v1228_v29, 1  ;;  %2167 = vmatmul.bf16.gmra.mxu1 %v3838_v19 }
 0x149   :  { %2196 = vmatmul.bf16.gmra.mxu2 %v3836_v18 }
 0x14a   :  { %v3989_v38 = vadd.f32 %v1396_v30, %v1380_v5  ;;  %2225 = vmatmul.bf16.gmra.mxu3 %v3838_v19  ;;  %v1381_v40 = vadd.f32 %v1365_v35, %v3947_v56 }
 0x14c   :  { %v1256_v41 = vpop.f32.mrf.mxu2  ;;  %v1200_v43 = vpop.f32.mrf.mxu0 }
 0x14d   :  { %v1285_v42 = vpop.f32.mrf.mxu3  ;;  %v1229_v48 = vpop.f32.mrf.mxu1 }
 0x14e   :  { %v1286_v45 = vadd.f32 %v1285_v42, %v1256_v41  ;;  %v1230_v51 = vadd.f32 %v1229_v48, %v1200_v43 }
 0x150   :  { %v1397_v54 = vrot.slane %v1286_v45, 2  ;;  %v1366_v3 = vrot.slane %v1230_v51, 1 }
 0x152   :  { %v3993_v50 = vadd.f32 %v1397_v54, %v1381_v40  ;;  %v1382_v58 = vadd.f32 %v1366_v3, %v3952_v22  ;;  %v636_v22 = vmax.f32 %v3917_v33, 0.0  ;;  %v637_v33 = vmax.f32 %v3922_v61, 0.0 }
 0x153   :  { %v638_v61 = vmax.f32 %v3931_v31, 0.0 }
 0x154   :  { %v1258_v55 = vpop.f32.mrf.mxu2  ;;  %v1203_v59 = vpop.f32.mrf.mxu0  ;;  %v645_v15 = vsel %vm644_vm0, %v636_v22, -inf  ;;  %v652_v30 = vsel %vm644_vm0, %v637_v33, -inf }
 0x155   :  { %v1287_v7 = vpop.f32.mrf.mxu3  ;;  %v1232_v62 = vpop.f32.mrf.mxu1  ;;  %v646_v20 = vrot.slane %v645_v15, 4  ;;  %v653_v42 = vrot.slane %v652_v30, 4 }
 0x156   :  { %v1288_v60 = vadd.f32 %v1287_v7, %v1258_v55  ;;  %v1233_v0 = vadd.f32 %v1232_v62, %v1203_v59 }
 0x157   :  { %2143 = vmatmul.bf16.gmra.mxu0 %v3856_v52  ;;  %v647_v25 = vmax.f32 %v645_v15, %v646_v20  ;;  %v654_v7 = vmax.f32 %v652_v30, %v653_v42  ;;  %v4029_v20 = vld [vmem:[%s4255_s2] ss:$0 sm:$0xff] }
 0x158   :  { %v1398_v1 = vrot.slane %v1288_v60, 2  ;;  %v1367_v56 = vrot.slane %v1233_v0, 1  ;;  %2172 = vmatmul.bf16.gmra.mxu1 %v3858_v53 }
 0x159   :  { %2201 = vmatmul.bf16.gmra.mxu2 %v3856_v52 }
 0x15a   :  { %v3999_v4 = vadd.f32 %v1398_v1, %v1382_v58  ;;  %2230 = vmatmul.bf16.gmra.mxu3 %v3858_v53  ;;  %v1383_v5 = vadd.f32 %v1367_v56, %v3961_v57  ;;  %v659_v58 = vsel %vm644_vm0, %v638_v61, -inf  ;;  %v655_v1 = vrot.slane %v654_v7, 2 }
 0x15b   :  { %v639_v56 = vmax.f32 %v3936_v13, 0.0  ;;  %v4034_v13 = vld [vmem:[%s4255_s2 + $0x3] ss:$0 sm:$0xff] }
 0x15c   :  { %v1261_v6 = vpop.f32.mrf.mxu2  ;;  %v1205_v10 = vpop.f32.mrf.mxu0 }
 0x15d   :  { %v1290_v9 = vpop.f32.mrf.mxu3  ;;  %v1234_v12 = vpop.f32.mrf.mxu1 }
 0x15e   :  { %v1291_v11 = vadd.f32 %v1290_v9, %v1261_v6  ;;  %v1235_v16 = vadd.f32 %v1234_v12, %v1205_v10 }
 0x160   :  { %v1399_v17 = vrot.slane %v1291_v11, 2  ;;  %v1368_v32 = vrot.slane %v1235_v16, 1 }
 0x162   :  { %v4005_v8 = vadd.f32 %v1399_v17, %v1383_v5  ;;  %v1384_v21 = vadd.f32 %v1368_v32, %v3966_v37  ;;  %v648_v37 = vrot.slane %v647_v25, 2 }
 0x164   :  { %v1263_v47 = vpop.f32.mrf.mxu2  ;;  %v1304_v24 = vpop.f32.mrf.mxu0  ;;  %v649_v3 = vmax.f32 %v647_v25, %v648_v37  ;;  %v4046_v25 = vld [vmem:[%s4255_s2 + $0x4] ss:$0 sm:$0xff] }
 0x165   :  { %v1292_v57 = vpop.f32.mrf.mxu3  ;;  %v1333_v28 = vpop.f32.mrf.mxu1 }
 0x166   :  { %v1293_v26 = vadd.f32 %v1292_v57, %v1263_v47  ;;  %v1334_v29 = vadd.f32 %v1333_v28, %v1304_v24  ;;  %v650_v0 = vrot.slane %v649_v3, 1  ;;  %v4041_v24 = vld [vmem:[%s4255_s2 + $0x1] ss:$0 sm:$0xff] }
 0x167   :  { %2244 = vmatmul.bf16.vlgmr.msrb.gmra.mxu0 %v3796_v44 }
 0x168   :  { %v1400_v35 = vrot.slane %v1293_v26, 2  ;;  %v1425_v40 = vrot.slane %v1334_v29, 3  ;;  %2273 = vmatmul.bf16.vlgmr.msrb.gmra.mxu1 %v3798_v49  ;;  %v651_v15 = vmax.f32 %v649_v3, %v650_v0  ;;  %v640_v29 = vmax.f32 %v3945_v46, 0.0 }
 0x169   :  { %2302 = vmatmul.bf16.vlgmr.msrb.gmra.mxu2 %v3796_v44 }
 0x16a   :  { %v4014_v41 = vadd.f32 %v1400_v35, %v1384_v21  ;;  %2331 = vmatmul.bf16.vlgmr.msrb.gmra.mxu3 %v3798_v49  ;;  %v1441_v43 = vadd.f32 %v1425_v40, %v3973_v14  ;;  %v660_v49 = vrot.slane %v659_v58, 4  ;;  %v666_v21 = vsel %vm644_vm0, %v639_v56, -inf }
 0x16b   :  { %v703_v37 = vmul.f32 %v4029_v20, %v651_v15  ;;  %v667_v42 = vrot.slane %v666_v21, 4 }
 0x16c   :  { %v2071_v45 = vpop.f32.mrf.mxu2  ;;  %v1449_v48 = vmax.f32 %v1441_v43, 0.0  ;;  %v1306_v54 = vpop.f32.mrf.mxu0  ;;  %v661_v9 = vmax.f32 %v659_v58, %v660_v49 }
 0x16d   :  { %v2100_v51 = vpop.f32.mrf.mxu3  ;;  %v1335_v44 = vpop.f32.mrf.mxu1 }
 0x16e   :  { %v4019_v55 = vadd.f32 %v2100_v51, %v2071_v45  ;;  %v1458_v31 = vsel %vm1457_vm1, %v1449_v48, -inf  ;;  %v1336_v59 = vadd.f32 %v1335_v44, %v1306_v54  ;;  %v662_v28 = vrot.slane %v661_v9, 2 }
 0x16f   :  { %v1459_v60 = vrot.slane %v1458_v31, 4  ;;  %v721_v45 = vmul.f32 %v4034_v13, %v651_v15 }
 0x170   :  { %v1426_v62 = vrot.slane %v1336_v59, 3  ;;  %v663_v3 = vmax.f32 %v661_v9, %v662_v28 }
 0x171   :  { %v1460_v14 = vmax.f32 %v1458_v31, %v1459_v60 }
 0x172   :  { %v1442_v22 = vadd.f32 %v1426_v62, %v3979_v23  ;;  %v656_v23 = vmax.f32 %v654_v7, %v655_v1  ;;  %v668_v62 = vmax.f32 %v666_v21, %v667_v42 }
 0x173   :  { %v1461_v5 = vrot.slane %v1460_v14, 2 }
 0x174   :  { %v2073_v6 = vpop.f32.mrf.mxu2  ;;  %v1450_v10 = vmax.f32 %v1442_v22, 0.0  ;;  %v1309_v12 = vpop.f32.mrf.mxu0  ;;  %v657_v61 = vrot.slane %v656_v23, 1  ;;  %v664_v22 = vrot.slane %v663_v3, 1  ;;  %v669_v15 = vrot.slane %v668_v62, 2 }
 0x175   :  { %v2102_v11 = vpop.f32.mrf.mxu3  ;;  %v1462_v16 = vmax.f32 %v1460_v14, %v1461_v5  ;;  %v1338_v32 = vpop.f32.mrf.mxu1 }
 0x176   :  { %v4024_v17 = vadd.f32 %v2102_v11, %v2073_v6  ;;  %v1465_v33 = vsel %vm1457_vm1, %v1450_v10, -inf  ;;  %v1339_v47 = vadd.f32 %v1338_v32, %v1309_v12  ;;  %v658_v49 = vmax.f32 %v656_v23, %v657_v61 }
 0x177   :  { %v1463_v57 = vrot.slane %v1462_v16, 1  ;;  %v1466_v26 = vrot.slane %v1465_v33, 4  ;;  %2249 = vmatmul.bf16.gmra.mxu0 %v3816_v34  ;;  %v641_v32 = vmax.f32 %v3950_v36, 0.0  ;;  %v670_v36 = vmax.f32 %v668_v62, %v669_v15 }
 0x178   :  { %v1427_v30 = vrot.slane %v1339_v47, 3  ;;  %2278 = vmatmul.bf16.gmra.mxu1 %v3818_v39  ;;  %v704_v11 = vmul.f32 %v4029_v20, %v658_v49  ;;  %v722_v12 = vmul.f32 %v4034_v13, %v658_v49  ;;  %v642_v49 = vmax.f32 %v3959_v27, 0.0 }
 0x179   :  { %2307 = vmatmul.bf16.gmra.mxu2 %v3816_v34  ;;  %v1464_v35 = vmax.f32 %v1462_v16, %v1463_v57  ;;  %v1467_v40 = vmax.f32 %v1465_v33, %v1466_v26  ;;  %v673_v34 = vsel %vm644_vm0, %v640_v29, -inf  ;;  %v665_v57 = vmax.f32 %v663_v3, %v664_v22 }
 0x17a   :  { %2336 = vmatmul.bf16.gmra.mxu3 %v3818_v39  ;;  %v1443_v43 = vadd.f32 %v1427_v30, %v3983_v2  ;;  %v674_v5 = vrot.slane %v673_v34, 4 }
 0x17b   :  { %v1516_v48 = vmul.f32 %v4041_v24, %v1464_v35  ;;  %v1534_v46 = vmul.f32 %v4046_v25, %v1464_v35  ;;  %v1468_v51 = vrot.slane %v1467_v40, 2  ;;  %v705_v3 = vmul.f32 %v4029_v20, %v665_v57 }
 0x17c   :  { %v2076_v54 = vpop.f32.mrf.mxu2  ;;  %v1451_v58 = vmax.f32 %v1443_v43, 0.0  ;;  %v1311_v39 = vpop.f32.mrf.mxu0  ;;  %v675_v26 = vmax.f32 %v673_v34, %v674_v5 }
 0x17d   :  { %v2105_v44 = vpop.f32.mrf.mxu3  ;;  %v4059_v7 = vadd.f32 %v1516_v48, %v703_v37  ;;  %v4061_v31 = vadd.f32 %v1534_v46, %v721_v45  ;;  %v1469_v59 = vmax.f32 %v1467_v40, %v1468_v51  ;;  %v1340_v60 = vpop.f32.mrf.mxu1  ;;  %v680_v45 = vsel %vm644_vm0, %v641_v32, -inf }
 0x17e   :  { %v4063_v2 = vadd.f32 %v2105_v44, %v2076_v54  ;;  %v1472_v0 = vsel %vm1457_vm1, %v1451_v58, -inf  ;;  %v1341_v14 = vadd.f32 %v1340_v60, %v1311_v39  ;;  %v676_v51 = vrot.slane %v675_v26, 2 }
 0x17f   :  { %v1470_v1 = vrot.slane %v1469_v59, 1  ;;  %v1473_v56 = vrot.slane %v1472_v0, 4  ;;  %v723_v44 = vmul.f32 %v4034_v13, %v665_v57  ;;  %v671_v39 = vrot.slane %v670_v36, 1 }
 0x180   :  { %v1428_v6 = vrot.slane %v1341_v14, 3 }
 0x181   :  { %v1471_v9 = vmax.f32 %v1469_v59, %v1470_v1  ;;  %v1474_v10 = vmax.f32 %v1472_v0, %v1473_v56  ;;  %v681_v59 = vrot.slane %v680_v45, 4  ;;  %v677_v1 = vmax.f32 %v675_v26, %v676_v51 }
 0x182   :  { %v1444_v16 = vadd.f32 %v1428_v6, %v3989_v38 }
 0x183   :  { %v1517_v23 = vmul.f32 %v4041_v24, %v1471_v9  ;;  %v1535_v21 = vmul.f32 %v4046_v25, %v1471_v9  ;;  %v1475_v33 = vrot.slane %v1474_v10, 2  ;;  %v682_v27 = vmax.f32 %v680_v45, %v681_v59 }
 0x184   :  { %v2078_v47 = vpop.f32.mrf.mxu2  ;;  %v1452_v28 = vmax.f32 %v1444_v16, 0.0  ;;  %v1314_v30 = vpop.f32.mrf.mxu0  ;;  %v687_v16 = vsel %vm644_vm0, %v642_v49, -inf }
 0x185   :  { %v2107_v29 = vpop.f32.mrf.mxu3  ;;  %v4072_v35 = vadd.f32 %v1517_v23, %v704_v11  ;;  %v4074_v40 = vadd.f32 %v1535_v21, %v722_v12  ;;  %v1476_v37 = vmax.f32 %v1474_v10, %v1475_v33  ;;  %v1343_v38 = vpop.f32.mrf.mxu1  ;;  %v672_v11 = vmax.f32 %v670_v36, %v671_v39 }
 0x186   :  { %v4076_v61 = vadd.f32 %v2107_v29, %v2078_v47  ;;  %v1479_v42 = vsel %vm1457_vm1, %v1452_v28, -inf  ;;  %v1344_v43 = vadd.f32 %v1343_v38, %v1314_v30  ;;  %v678_v21 = vrot.slane %v677_v1, 1 }
 0x187   :  { %v1477_v48 = vrot.slane %v1476_v37, 1  ;;  %v1480_v46 = vrot.slane %v1479_v42, 4  ;;  %2254 = vmatmul.bf16.gmra.mxu0 %v3836_v18  ;;  %v706_v26 = vmul.f32 %v4029_v20, %v672_v11  ;;  %v683_v28 = vrot.slane %v682_v27, 2 }
 0x188   :  { %v1429_v54 = vrot.slane %v1344_v43, 3  ;;  %2283 = vmatmul.bf16.gmra.mxu1 %v3838_v19  ;;  %v688_v29 = vrot.slane %v687_v16, 4  ;;  %v679_v45 = vmax.f32 %v677_v1, %v678_v21 }
 0x189   :  { %2312 = vmatmul.bf16.gmra.mxu2 %v3836_v18  ;;  %v1478_v34 = vmax.f32 %v1476_v37, %v1477_v48  ;;  %v1481_v58 = vmax.f32 %v1479_v42, %v1480_v46  ;;  %v724_v37 = vmul.f32 %v4034_v13, %v672_v11  ;;  %v643_v48 = vmax.f32 %v3964_v63, 0.0 }
 0x18a   :  { %2341 = vmatmul.bf16.gmra.mxu3 %v3838_v19  ;;  %v1445_v60 = vadd.f32 %v1429_v54, %v3993_v50  ;;  %v684_v39 = vmax.f32 %v682_v27, %v683_v28  ;;  %v689_v59 = vmax.f32 %v687_v16, %v688_v29 }
 0x18b   :  { %v1518_v62 = vmul.f32 %v4041_v24, %v1478_v34  ;;  %v1536_v0 = vmul.f32 %v4046_v25, %v1478_v34  ;;  %v1482_v14 = vrot.slane %v1481_v58, 2  ;;  %v694_v63 = vsel %vm644_vm0, %v643_v48, -inf }
 0x18c   :  { %v2081_v18 = vpop.f32.mrf.mxu2  ;;  %v1453_v56 = vmax.f32 %v1445_v60, 0.0  ;;  %v1316_v5 = vpop.f32.mrf.mxu0  ;;  %v695_v11 = vrot.slane %v694_v63, 4 }
 0x18d   :  { %v2110_v22 = vpop.f32.mrf.mxu3  ;;  %v4090_v6 = vadd.f32 %v1518_v62, %v705_v3  ;;  %v4092_v19 = vadd.f32 %v1536_v0, %v723_v44  ;;  %v1483_v9 = vmax.f32 %v1481_v58, %v1482_v14  ;;  %v1345_v50 = vpop.f32.mrf.mxu1 }
 0x18e   :  { %v4094_v10 = vadd.f32 %v2110_v22, %v2081_v18  ;;  %v1486_v12 = vsel %vm1457_vm1, %v1453_v56, -inf  ;;  %v1346_v15 = vadd.f32 %v1345_v50, %v1316_v5  ;;  %v707_v18 = vmul.f32 %v4029_v20, %v679_v45 }
 0x18f   :  { %v1484_v32 = vrot.slane %v1483_v9, 1  ;;  %v1487_v23 = vrot.slane %v1486_v12, 4  ;;  %v725_v22 = vmul.f32 %v4034_v13, %v679_v45  ;;  %v685_v5 = vrot.slane %v684_v39, 1 }
 0x190   :  { %v1430_v33 = vrot.slane %v1346_v15, 3 }
 0x191   :  { %v1485_v47 = vmax.f32 %v1483_v9, %v1484_v32  ;;  %v1488_v57 = vmax.f32 %v1486_v12, %v1487_v23  ;;  %v690_v9 = vrot.slane %v689_v59, 2 }
 0x192   :  { %v1446_v30 = vadd.f32 %v1430_v33, %v3999_v4 }
 0x193   :  { %v1519_v38 = vmul.f32 %v4041_v24, %v1485_v47  ;;  %v1537_v36 = vmul.f32 %v4046_v25, %v1485_v47  ;;  %v1489_v42 = vrot.slane %v1488_v57, 2 }
 0x194   :  { %v2083_v43 = vpop.f32.mrf.mxu2  ;;  %v1454_v46 = vmax.f32 %v1446_v30, 0.0  ;;  %v1319_v54 = vpop.f32.mrf.mxu0  ;;  %v696_v30 = vmax.f32 %v694_v63, %v695_v11 }
 0x195   :  { %v2112_v51 = vpop.f32.mrf.mxu3  ;;  %v4104_v3 = vadd.f32 %v1519_v38, %v706_v26  ;;  %v4106_v34 = vadd.f32 %v1537_v36, %v724_v37  ;;  %v1490_v58 = vmax.f32 %v1488_v57, %v1489_v42  ;;  %v1348_v44 = vpop.f32.mrf.mxu1  ;;  %v686_v26 = vmax.f32 %v684_v39, %v685_v5 }
 0x196   :  { %v4108_v4 = vadd.f32 %v2112_v51, %v2083_v43  ;;  %v1493_v60 = vsel %vm1457_vm1, %v1454_v46, -inf  ;;  %v1349_v49 = vadd.f32 %v1348_v44, %v1319_v54  ;;  %v697_v54 = vrot.slane %v696_v30, 2 }
 0x197   :  { %v1491_v62 = vrot.slane %v1490_v58, 1  ;;  %v1494_v0 = vrot.slane %v1493_v60, 4  ;;  %2259 = vmatmul.bf16.gmra.mxu0 %v3856_v52  ;;  %v708_v45 = vmul.f32 %v4029_v20, %v686_v26  ;;  %v726_v51 = vmul.f32 %v4034_v13, %v686_v26 }
 0x198   :  { %v1431_v14 = vrot.slane %v1349_v49, 3  ;;  %2288 = vmatmul.bf16.gmra.mxu1 %v3858_v53  ;;  %v698_v5 = vmax.f32 %v696_v30, %v697_v54 }
 0x199   :  { %2317 = vmatmul.bf16.gmra.mxu2 %v3856_v52  ;;  %v1492_v1 = vmax.f32 %v1490_v58, %v1491_v62  ;;  %v1495_v56 = vmax.f32 %v1493_v60, %v1494_v0 }
 0x19a   :  { %2346 = vmatmul.bf16.gmra.mxu3 %v3858_v53  ;;  %v1447_v50 = vadd.f32 %v1431_v14, %v4005_v8  ;;  %v691_v8 = vmax.f32 %v689_v59, %v690_v9 }
 0x19b   :  { %v1520_v27 = vmul.f32 %v4041_v24, %v1492_v1  ;;  %v1538_v12 = vmul.f32 %v4046_v25, %v1492_v1  ;;  %v1496_v15 = vrot.slane %v1495_v56, 2 }
 0x19c   :  { %v2086_v16 = vpop.f32.mrf.mxu2  ;;  %v1455_v52 = vmax.f32 %v1447_v50, 0.0  ;;  %v1321_v23 = vpop.f32.mrf.mxu0  ;;  %v692_v48 = vrot.slane %v691_v8, 1 }
 0x19d   :  { %v2115_v32 = vpop.f32.mrf.mxu3  ;;  %v1497_v21 = vmax.f32 %v1495_v56, %v1496_v15  ;;  %v1350_v53 = vpop.f32.mrf.mxu1  ;;  %v4123_v47 = vadd.f32 %v1538_v12, %v725_v22  ;;  %v4125_v57 = vadd.f32 %v1520_v27, %v707_v18 }
 0x19e   :  { %v4121_v33 = vadd.f32 %v2115_v32, %v2086_v16  ;;  %v1500_v28 = vsel %vm1457_vm1, %v1455_v52, -inf  ;;  %v1351_v29 = vadd.f32 %v1350_v53, %v1321_v23  ;;  %v699_v32 = vrot.slane %v698_v5, 1 }
 0x19f   :  { %v1498_v37 = vrot.slane %v1497_v21, 1  ;;  %v1501_v38 = vrot.slane %v1500_v28, 4 }
 0x1a0   :  { %v1432_v36 = vrot.slane %v1351_v29, 3 }
 0x1a1   :  { %v1499_v42 = vmax.f32 %v1497_v21, %v1498_v37  ;;  %v1502_v43 = vmax.f32 %v1500_v28, %v1501_v38 }
 0x1a2   :  { %v1448_v46 = vadd.f32 %v1432_v36, %v4014_v41  ;;  %v693_v41 = vmax.f32 %v691_v8, %v692_v48 }
 0x1a3   :  { %v1521_v58 = vmul.f32 %v4041_v24, %v1499_v42  ;;  %v1539_v44 = vmul.f32 %v4046_v25, %v1499_v42  ;;  %v1503_v39 = vrot.slane %v1502_v43, 2 }
 0x1a4   :  { %v2088_v59 = vpop.f32.mrf.mxu2  ;;  %v1456_v60 = vmax.f32 %v1448_v46, 0.0  ;;  %v2129_v62 = vpop.f32.mrf.mxu0  ;;  %v727_v16 = vmul.f32 %v4034_v13, %v693_v41  ;;  %v709_v52 = vmul.f32 %v4029_v20, %v693_v41 }
 0x1a5   :  { %v2117_v49 = vpop.f32.mrf.mxu3  ;;  %v1504_v0 = vmax.f32 %v1502_v43, %v1503_v39  ;;  %v2158_v14 = vpop.f32.mrf.mxu1  ;;  %v4135_v18 = vadd.f32 %v1539_v44, %v726_v51  ;;  %v4137_v1 = vadd.f32 %v1521_v58, %v708_v45  ;;  %v700_v45 = vmax.f32 %v698_v5, %v699_v32 }
 0x1a6   :  { %v4133_v63 = vadd.f32 %v2117_v49, %v2088_v59  ;;  %v1507_v56 = vsel %vm1457_vm1, %v1456_v60, -inf  ;;  %v2159_v22 = vadd.f32 %v2158_v14, %v2129_v62 }
 0x1a7   :  { %v1505_v9 = vrot.slane %v1504_v0, 1  ;;  %v1508_v50 = vrot.slane %v1507_v56, 4  ;;  %v728_v44 = vmul.f32 %v4034_v13, %v700_v45  ;;  %v710_v59 = vmul.f32 %v4029_v20, %v700_v45 }
 0x1a8   :  { %v2360_v11 = vrot.slane %v2159_v22, 1 }
 0x1a9   :  { %v1506_v27 = vmax.f32 %v1504_v0, %v1505_v9  ;;  %v1509_v12 = vmax.f32 %v1507_v56, %v1508_v50 }
 0x1aa   :  { %v2376_v15 = vadd.f32 %v2360_v11, %v4019_v55 }
 0x1ab   :  { %v1510_v23 = vrot.slane %v1509_v12, 2  ;;  %v1540_v53 = vmul.f32 %v4046_v25, %v1506_v27  ;;  %v1522_v26 = vmul.f32 %v4041_v24, %v1506_v27 }
 0x1ac   :  { %v2187_v21 = vpop.f32.mrf.mxu2  ;;  %v2131_v28 = vpop.f32.mrf.mxu0 }
 0x1ad   :  { %v2216_v8 = vpop.f32.mrf.mxu3  ;;  %v1511_v29 = vmax.f32 %v1509_v12, %v1510_v23  ;;  %v2160_v37 = vpop.f32.mrf.mxu1  ;;  %v4145_v38 = vadd.f32 %v1540_v53, %v727_v16  ;;  %v4147_v36 = vadd.f32 %v1522_v26, %v709_v52 }
 0x1ae   :  { %v2217_v30 = vadd.f32 %v2216_v8, %v2187_v21  ;;  %v2161_v55 = vadd.f32 %v2160_v37, %v2131_v28 }
 0x1af   :  { %v1512_v42 = vrot.slane %v1511_v29, 1 }
 0x1b0   :  { %v2392_v43 = vrot.slane %v2217_v30, 2  ;;  %v2361_v48 = vrot.slane %v2161_v55, 1 }
 0x1b1   :  { %v1513_v46 = vmax.f32 %v1511_v29, %v1512_v42 }
 0x1b2   :  { %v4149_v51 = vadd.f32 %v2392_v43, %v2376_v15  ;;  %v2377_v54 = vadd.f32 %v2361_v48, %v4024_v17 }
 0x1b3   :  { %v1541_v39 = vmul.f32 %v4046_v25, %v1513_v46  ;;  %v1523_v60 = vmul.f32 %v4041_v24, %v1513_v46 }
 0x1b4   :  { %v2189_v58 = vpop.f32.mrf.mxu2  ;;  %v2134_v62 = vpop.f32.mrf.mxu0 }
 0x1b5   :  { %v2218_v49 = vpop.f32.mrf.mxu3  ;;  %v2163_v14 = vpop.f32.mrf.mxu1  ;;  %v4156_v41 = vadd.f32 %v1541_v39, %v728_v44  ;;  %v4158_v56 = vadd.f32 %v1523_v60, %v710_v59 }
 0x1b6   :  { %v2219_v0 = vadd.f32 %v2218_v49, %v2189_v58  ;;  %v2164_v22 = vadd.f32 %v2163_v14, %v2134_v62 }
 0x1b8   :  { %v2393_v5 = vrot.slane %v2219_v0, 2  ;;  %v2362_v17 = vrot.slane %v2164_v22, 1 }
 0x1ba   :  { %v4160_v9 = vadd.f32 %v2393_v5, %v2377_v54  ;;  %v2378_v13 = vadd.f32 %v2362_v17, %v4063_v2 }
 0x1bc   :  { %v2192_v25 = vpop.f32.mrf.mxu2  ;;  %v2136_v20 = vpop.f32.mrf.mxu0 }
 0x1bd   :  { %v2221_v50 = vpop.f32.mrf.mxu3  ;;  %v2165_v24 = vpop.f32.mrf.mxu1 }
 0x1be   :  { %v2222_v11 = vadd.f32 %v2221_v50, %v2192_v25  ;;  %v2166_v27 = vadd.f32 %v2165_v24, %v2136_v20 }
 0x1c0   :  { %v2394_v12 = vrot.slane %v2222_v11, 2  ;;  %v2363_v15 = vrot.slane %v2166_v27, 1 }
 0x1c2   :  { %v4163_v16 = vadd.f32 %v2394_v12, %v2378_v13  ;;  %v2379_v52 = vadd.f32 %v2363_v15, %v4076_v61 }
 0x1c4   :  { %v2194_v32 = vpop.f32.mrf.mxu2  ;;  %v2139_v21 = vpop.f32.mrf.mxu0 }
 0x1c5   :  { %v2223_v23 = vpop.f32.mrf.mxu3  ;;  %v2168_v26 = vpop.f32.mrf.mxu1 }
 0x1c6   :  { %v2224_v53 = vadd.f32 %v2223_v23, %v2194_v32  ;;  %v2169_v8 = vadd.f32 %v2168_v26, %v2139_v21 }
 0x1c8   :  { %v2395_v28 = vrot.slane %v2224_v53, 2  ;;  %v2364_v2 = vrot.slane %v2169_v8, 1 }
 0x1ca   :  { %v4166_v29 = vadd.f32 %v2395_v28, %v2379_v52  ;;  %v2380_v30 = vadd.f32 %v2364_v2, %v4094_v10 }
 0x1cc   :  { %v2197_v37 = vpop.f32.mrf.mxu2  ;;  %v2141_v42 = vpop.f32.mrf.mxu0 }
 0x1cd   :  { %v2226_v55 = vpop.f32.mrf.mxu3  ;;  %v2170_v45 = vpop.f32.mrf.mxu1 }
 0x1ce   :  { %v2227_v43 = vadd.f32 %v2226_v55, %v2197_v37  ;;  %v2171_v48 = vadd.f32 %v2170_v45, %v2141_v42 }
 0x1d0   :  { %v2396_v46 = vrot.slane %v2227_v43, 2  ;;  %v2365_v61 = vrot.slane %v2171_v48, 1 }
 0x1d2   :  { %v4169_v54 = vadd.f32 %v2396_v46, %v2380_v30  ;;  %v2381_v58 = vadd.f32 %v2365_v61, %v4108_v4 }
 0x1d4   :  { %v2199_v44 = vpop.f32.mrf.mxu2  ;;  %v2144_v59 = vpop.f32.mrf.mxu0 }
 0x1d5   :  { %v2228_v39 = vpop.f32.mrf.mxu3  ;;  %v2173_v49 = vpop.f32.mrf.mxu1 }
 0x1d6   :  { %v2229_v60 = vadd.f32 %v2228_v39, %v2199_v44  ;;  %v2174_v62 = vadd.f32 %v2173_v49, %v2144_v59 }
 0x1d8   :  { %v2397_v0 = vrot.slane %v2229_v60, 2  ;;  %v2366_v10 = vrot.slane %v2174_v62, 1 }
 0x1da   :  { %v4172_v14 = vadd.f32 %v2397_v0, %v2381_v58  ;;  %v2382_v22 = vadd.f32 %v2366_v10, %v4121_v33 }
 0x1dc   :  { %v2202_v5 = vpop.f32.mrf.mxu2  ;;  %v4175_v13 = vpop.f32.mrf.mxu0 }
 0x1dd   :  { %v2231_v17 = vpop.f32.mrf.mxu3  ;;  %v4177_v50 = vpop.f32.mrf.mxu1 }
 0x1de   :  { %v2232_v25 = vadd.f32 %v2231_v17, %v2202_v5 }
 0x1e0   :  { %v2398_v4 = vrot.slane %v2232_v25, 2 }
 0x1e2   :  { %v4179_v20 = vadd.f32 %v2398_v4, %v2382_v22 }
 0x1e4   :  { %v4181_v11 = vpop.f32.mrf.mxu2  ;;  %v2245_v27 = vpop.f32.mrf.mxu0 }
 0x1e5   :  { %v4183_v24 = vpop.f32.mrf.mxu3  ;;  %v2274_v12 = vpop.f32.mrf.mxu1 }
 0x1e6   :  { %v2275_v15 = vadd.f32 %v2274_v12, %v2245_v27  ;;  %v4197_v12 = vld [vmem:[%s4255_s2 + $0x5] ss:$0 sm:$0xff] }
 0x1e8   :  { %v2424_v52 = vrot.slane %v2275_v15, 3 }
 0x1ea   :  { %v2440_v26 = vadd.f32 %v2424_v52, %v4149_v51 }
 0x1ec   :  { %v2303_v32 = vpop.f32.mrf.mxu2  ;;  %v2247_v23 = vpop.f32.mrf.mxu0 }
 0x1ed   :  { %v2332_v33 = vpop.f32.mrf.mxu3  ;;  %v2276_v53 = vpop.f32.mrf.mxu1 }
 0x1ee   :  { %v2333_v21 = vadd.f32 %v2332_v33, %v2303_v32  ;;  %v2277_v28 = vadd.f32 %v2276_v53, %v2247_v23 }
 0x1f0   :  { %v2456_v8 = vrot.slane %v2333_v21, 4  ;;  %v2425_v37 = vrot.slane %v2277_v28, 3 }
 0x1f2   :  { %v2472_v2 = vadd.f32 %v2456_v8, %v2440_v26  ;;  %v2441_v58 = vadd.f32 %v2425_v37, %v4160_v9  ;;  %v4192_v9 = vld [vmem:[%s4255_s2 + $0x2] ss:$0 sm:$0xff] }
 0x1f4   :  { %v2480_v30 = vmax.f32 %v2472_v2, 0.0  ;;  %v2305_v55 = vpop.f32.mrf.mxu2  ;;  %v2250_v43 = vpop.f32.mrf.mxu0 }
 0x1f5   :  { %v2334_v42 = vpop.f32.mrf.mxu3  ;;  %v2279_v46 = vpop.f32.mrf.mxu1 }
 0x1f6   :  { %v2489_v45 = vsel %vm2488_vm2, %v2480_v30, -inf  ;;  %v2335_v48 = vadd.f32 %v2334_v42, %v2305_v55  ;;  %v2280_v39 = vadd.f32 %v2279_v46, %v2250_v43 }
 0x1f7   :  { %v2490_v61 = vrot.slane %v2489_v45, 4 }
 0x1f8   :  { %v2457_v44 = vrot.slane %v2335_v48, 4  ;;  %v2426_v62 = vrot.slane %v2280_v39, 3 }
 0x1f9   :  { %v2491_v59 = vmax.f32 %v2489_v45, %v2490_v61 }
 0x1fa   :  { %v2473_v51 = vadd.f32 %v2457_v44, %v2441_v58  ;;  %v2442_v52 = vadd.f32 %v2426_v62, %v4163_v16 }
 0x1fb   :  { %v2492_v60 = vrot.slane %v2491_v59, 2 }
 0x1fc   :  { %v2481_v49 = vmax.f32 %v2473_v51, 0.0  ;;  %v2308_v0 = vpop.f32.mrf.mxu2  ;;  %v2252_v5 = vpop.f32.mrf.mxu0 }
 0x1fd   :  { %v2493_v10 = vmax.f32 %v2491_v59, %v2492_v60  ;;  %v2337_v22 = vpop.f32.mrf.mxu3  ;;  %v2281_v4 = vpop.f32.mrf.mxu1 }
 0x1fe   :  { %v2496_v17 = vsel %vm2488_vm2, %v2481_v49, -inf  ;;  %v2338_v25 = vadd.f32 %v2337_v22, %v2308_v0  ;;  %v2282_v33 = vadd.f32 %v2281_v4, %v2252_v5 }
 0x1ff   :  { %v2494_v27 = vrot.slane %v2493_v10, 1  ;;  %v2497_v15 = vrot.slane %v2496_v17, 4 }
 0x200   :  { %v2458_v32 = vrot.slane %v2338_v25, 4  ;;  %v2427_v30 = vrot.slane %v2282_v33, 3 }
 0x201   :  { %v2495_v23 = vmax.f32 %v2493_v10, %v2494_v27  ;;  %v2498_v21 = vmax.f32 %v2496_v17, %v2497_v15 }
 0x202   :  { %v2474_v53 = vadd.f32 %v2458_v32, %v2442_v52  ;;  %v2443_v39 = vadd.f32 %v2427_v30, %v4166_v29 }
 0x203   :  { %v2547_v26 = vmul.f32 %v4192_v9, %v2495_v23  ;;  %v2565_v8 = vmul.f32 %v4197_v12, %v2495_v23  ;;  %v2499_v28 = vrot.slane %v2498_v21, 2 }
 0x204   :  { %v2482_v2 = vmax.f32 %v2474_v53, 0.0  ;;  %v2310_v37 = vpop.f32.mrf.mxu2  ;;  %v2255_v16 = vpop.f32.mrf.mxu0 }
 0x205   :  { %v2555_v55 = vadd.f32 %v2547_v26, %v4059_v7  ;;  %v2573_v42 = vadd.f32 %v2565_v8, %v4061_v31  ;;  %v2500_v43 = vmax.f32 %v2498_v21, %v2499_v28  ;;  %v2339_v45 = vpop.f32.mrf.mxu3  ;;  %v2284_v61 = vpop.f32.mrf.mxu1 }
 0x206   :  { %v2503_v48 = vsel %vm2488_vm2, %v2482_v2, -inf  ;;  %v2340_v46 = vadd.f32 %v2339_v45, %v2310_v37  ;;  %v2285_v51 = vadd.f32 %v2284_v61, %v2255_v16 }
 0x207   :  { %v2501_v58 = vrot.slane %v2500_v43, 1  ;;  %v2504_v44 = vrot.slane %v2503_v48, 4 }
 0x208   :  { %v2459_v59 = vrot.slane %v2340_v46, 4  ;;  %v2428_v22 = vrot.slane %v2285_v51, 3 }
 0x209   :  { %v2502_v60 = vmax.f32 %v2500_v43, %v2501_v58  ;;  %v2505_v49 = vmax.f32 %v2503_v48, %v2504_v44 }
 0x20a   :  { %v2475_v62 = vadd.f32 %v2459_v59, %v2443_v39  ;;  %v2444_v26 = vadd.f32 %v2428_v22, %v4169_v54 }
 0x20b   :  { %v2548_v7 = vmul.f32 %v4192_v9, %v2502_v60  ;;  %v2566_v31 = vmul.f32 %v4197_v12, %v2502_v60  ;;  %v2506_v0 = vrot.slane %v2505_v49, 2 }
 0x20c   :  { %v2483_v10 = vmax.f32 %v2475_v62, 0.0  ;;  %v2313_v5 = vpop.f32.mrf.mxu2  ;;  %v2257_v29 = vpop.f32.mrf.mxu0 }
 0x20d   :  { %v2556_v17 = vadd.f32 %v2548_v7, %v4072_v35  ;;  %v2574_v25 = vadd.f32 %v2566_v31, %v4074_v40  ;;  %v2507_v4 = vmax.f32 %v2505_v49, %v2506_v0  ;;  %v2342_v27 = vpop.f32.mrf.mxu3  ;;  %v2286_v32 = vpop.f32.mrf.mxu1 }
 0x20e   :  { %v2510_v15 = vsel %vm2488_vm2, %v2483_v10, -inf  ;;  %v2343_v52 = vadd.f32 %v2342_v27, %v2313_v5  ;;  %v2287_v28 = vadd.f32 %v2286_v32, %v2257_v29 }
 0x20f   :  { %v2589_v33 = vrot.slane %v2556_v17, 7  ;;  %v2624_v23 = vrot.slane %v2574_v25, 7  ;;  %v2508_v21 = vrot.slane %v2507_v4, 1  ;;  %v2511_v53 = vrot.slane %v2510_v15, 4 }
 0x210   :  { %v2460_v8 = vrot.slane %v2343_v52, 4  ;;  %v2429_v46 = vrot.slane %v2287_v28, 3  ;;  %v2176_v25 = vadd.f32 %v4177_v50, %v4175_v13 }
 0x211   :  { %v2509_v2 = vmax.f32 %v2507_v4, %v2508_v21  ;;  %v2512_v35 = vmax.f32 %v2510_v15, %v2511_v53  ;;  %v2625_v30 = vsel %vm2590_vm3, %v2624_v23, %v2573_v42  ;;  %v2591_v40 = vsel %vm2590_vm3, %v2589_v33, %v2555_v55 }
 0x212   :  { %v2476_v37 = vadd.f32 %v2460_v8, %v2444_v26  ;;  %v2445_v31 = vadd.f32 %v2429_v46, %v4172_v14  ;;  %v2234_v26 = vadd.f32 %v4183_v24, %v4181_v11  ;;  %v2367_v28 = vrot.slane %v2176_v25, 1 }
 0x213   :  { %v2549_v43 = vmul.f32 %v4192_v9, %v2509_v2  ;;  %v2567_v45 = vmul.f32 %v4197_v12, %v2509_v2  ;;  %v2513_v16 = vrot.slane %v2512_v35, 2 }
 0x214   :  { %v2484_v48 = vmax.f32 %v2476_v37, 0.0  ;;  %v2315_v61 = vpop.f32.mrf.mxu2  ;;  %v2260_v59 = vpop.f32.mrf.mxu0 }
 0x215   :  { %v2557_v58 = vadd.f32 %v2549_v43, %v4090_v6  ;;  %v2575_v44 = vadd.f32 %v2567_v45, %v4092_v19  ;;  %v2514_v54 = vmax.f32 %v2512_v35, %v2513_v16  ;;  %v2344_v39 = vpop.f32.mrf.mxu3  ;;  %v2289_v55 = vpop.f32.mrf.mxu1 }
 0x216   :  { %v2517_v51 = vsel %vm2488_vm2, %v2484_v48, -inf  ;;  %v2345_v42 = vadd.f32 %v2344_v39, %v2315_v61  ;;  %v2290_v10 = vadd.f32 %v2289_v55, %v2260_v59  ;;  %v2399_v48 = vrot.slane %v2234_v26, 2 }
 0x217   :  { %v2592_v60 = vrot.slane %v2557_v58, 6  ;;  %v2626_v49 = vrot.slane %v2575_v44, 6  ;;  %v2515_v62 = vrot.slane %v2514_v54, 1  ;;  %v2518_v7 = vrot.slane %v2517_v51, 4 }
 0x218   :  { %v2461_v0 = vrot.slane %v2345_v42, 4  ;;  %v2430_v52 = vrot.slane %v2290_v10, 3  ;;  %v2383_v44 = vadd.f32 %v2367_v28, %v4133_v63 }
 0x219   :  { %v2516_v22 = vmax.f32 %v2514_v54, %v2515_v62  ;;  %v2519_v6 = vmax.f32 %v2517_v51, %v2518_v7  ;;  %v2627_v5 = vsel %vm2593_vm4, %v2626_v49, %v2625_v30  ;;  %v2594_v19 = vsel %vm2593_vm4, %v2592_v60, %v2591_v40 }
 0x21a   :  { %v2477_v17 = vadd.f32 %v2461_v0, %v2445_v31  ;;  %v2446_v40 = vadd.f32 %v2430_v52, %v4179_v20  ;;  %v2415_v60 = vadd.f32 %v2399_v48, %v2383_v44 }
 0x21b   :  { %v2550_v4 = vmul.f32 %v4192_v9, %v2516_v22  ;;  %v2568_v27 = vmul.f32 %v4197_v12, %v2516_v22  ;;  %v2520_v29 = vrot.slane %v2519_v6, 2 }
 0x21c   :  { %v2485_v15 = vmax.f32 %v2477_v17, 0.0  ;;  %v2318_v32 = vpop.f32.mrf.mxu2  ;;  %v2262_v23 = vpop.f32.mrf.mxu0 }
 0x21d   :  { %v2521_v33 = vmax.f32 %v2519_v6, %v2520_v29  ;;  %v2347_v14 = vpop.f32.mrf.mxu3  ;;  %v2576_v21 = vadd.f32 %v2568_v27, %v4106_v34  ;;  %v2558_v53 = vadd.f32 %v2550_v4, %v4104_v3  ;;  %v2291_v8 = vpop.f32.mrf.mxu1 }
 0x21e   :  { %v2524_v13 = vsel %vm2488_vm2, %v2485_v15, -inf  ;;  %v2348_v50 = vadd.f32 %v2347_v14, %v2318_v32  ;;  %v2292_v43 = vadd.f32 %v2291_v8, %v2262_v23 }
 0x21f   :  { %v2522_v2 = vrot.slane %v2521_v33, 1  ;;  %v2525_v35 = vrot.slane %v2524_v13, 4  ;;  %v2628_v30 = vrot.slane %v2576_v21, 5  ;;  %v2595_v45 = vrot.slane %v2558_v53, 5 }
 0x220   :  { %v2462_v37 = vrot.slane %v2348_v50, 4  ;;  %v2431_v39 = vrot.slane %v2292_v43, 3 }
 0x221   :  { %v2523_v34 = vmax.f32 %v2521_v33, %v2522_v2  ;;  %v2526_v16 = vmax.f32 %v2524_v13, %v2525_v35  ;;  %v2629_v3 = vsel %vm2596_vm5, %v2628_v30, %v2627_v5  ;;  %v2597_v11 = vsel %vm2596_vm5, %v2595_v45, %v2594_v19 }
 0x222   :  { %v2478_v46 = vadd.f32 %v2462_v37, %v2446_v40  ;;  %v2447_v22 = vadd.f32 %v2431_v39, %v2415_v60 }
 0x223   :  { %v2551_v24 = vmul.f32 %v4192_v9, %v2523_v34  ;;  %v2569_v61 = vmul.f32 %v4197_v12, %v2523_v34  ;;  %v2527_v58 = vrot.slane %v2526_v16, 2 }
 0x224   :  { %v2486_v54 = vmax.f32 %v2478_v46, 0.0  ;;  %v2320_v59 = vpop.f32.mrf.mxu2 }
 0x225   :  { %v2528_v20 = vmax.f32 %v2526_v16, %v2527_v58  ;;  %v2349_v51 = vpop.f32.mrf.mxu3  ;;  %v2577_v42 = vadd.f32 %v2569_v61, %v4123_v47  ;;  %v2559_v55 = vadd.f32 %v2551_v24, %v4125_v57  ;;  %v3721_v61 = vld [vmem:[%s4255_s2 + $0x6] ss:$0 sm:$0xff] }
 0x226   :  { %v2531_v49 = vsel %vm2488_vm2, %v2486_v54, -inf  ;;  %v2350_v62 = vadd.f32 %v2349_v51, %v2320_v59 }
 0x227   :  { %v2529_v7 = vrot.slane %v2528_v20, 1  ;;  %v2532_v31 = vrot.slane %v2531_v49, 4  ;;  %v2630_v0 = vrot.slane %v2577_v42, 4  ;;  %v2598_v10 = vrot.slane %v2559_v55, 4 }
 0x228   :  { %v2463_v63 = vrot.slane %v2350_v62, 4  ;;  %v3759_v42 = vmov 0  }
 0x229   :  { %v2530_v6 = vmax.f32 %v2528_v20, %v2529_v7  ;;  %v2533_v5 = vmax.f32 %v2531_v49, %v2532_v31  ;;  %v2631_v19 = vsel %vm2599_vm6, %v2630_v0, %v2629_v3  ;;  %v2600_v17 = vsel %vm2599_vm6, %v2598_v10, %v2597_v11  ;;  %3713 = vset.pattern.permute.xlu1 %v3759_v42 }
 0x22a   :  { %v2479_v25 = vadd.f32 %v2463_v63, %v2447_v22 }
 0x22b   :  { %v2534_v4 = vrot.slane %v2533_v5, 2  ;;  %v2570_v47 = vmul.f32 %v4197_v12, %v2530_v6  ;;  %v2552_v57 = vmul.f32 %v4192_v9, %v2530_v6 }
 0x22c   :  { %v2487_v27 = vmax.f32 %v2479_v25, 0.0 }
 0x22d   :  { %v2535_v29 = vmax.f32 %v2533_v5, %v2534_v4  ;;  %v2578_v15 = vadd.f32 %v2570_v47, %v4135_v18  ;;  %v2560_v52 = vadd.f32 %v2552_v57, %v4137_v1  ;;  %v3760_v4 = vmov 1  }
 0x22e   :  { %v2538_v32 = vsel %vm2488_vm2, %v2487_v27, -inf  ;;  %3712 = vset.pattern.permute.xlu0 %v3760_v4  ;;  %v2677_v27 = vlaneseq }
 0x22f   :  { %v2536_v33 = vrot.slane %v2535_v29, 1  ;;  %v2539_v14 = vrot.slane %v2538_v32, 4  ;;  %v2632_v23 = vrot.slane %v2578_v15, 3  ;;  %v2601_v21 = vrot.slane %v2560_v52, 3 }
 0x231   :  { %v2537_v53 = vmax.f32 %v2535_v29, %v2536_v33  ;;  %v2540_v26 = vmax.f32 %v2538_v32, %v2539_v14  ;;  %v2633_v13 = vsel %vm2602_vm7, %v2632_v23, %v2631_v19  ;;  %v2603_v50 = vsel %vm2602_vm7, %v2601_v21, %v2600_v17 }
 0x232   :  { %v2678_v29 = vand.u32 127, %v2677_v27 }
 0x233   :  { %v2541_v8 = vrot.slane %v2540_v26, 2  ;;  %v2571_v28 = vmul.f32 %v4197_v12, %v2537_v53  ;;  %v2553_v2 = vmul.f32 %v4192_v9, %v2537_v53 }
 0x234   :  { %vm2681_vm14 = vcmp.eq.s32.totalorder %v2678_v29, 1  ;;  %vm2679_vm15 = vcmp.eq.s32.totalorder %v2678_v29, 0 }
 0x235   :  { %v2542_v35 = vmax.f32 %v2540_v26, %v2541_v8  ;;  %v2579_v18 = vadd.f32 %v2571_v28, %v4145_v38  ;;  %v2561_v1 = vadd.f32 %v2553_v2, %v4147_v36 }
 0x237   :  { %v2543_v30 = vrot.slane %v2542_v35, 1  ;;  %v2634_v40 = vrot.slane %v2579_v18, 2  ;;  %v2604_v37 = vrot.slane %v2561_v1, 2 }
 0x239   :  { %v2544_v43 = vmax.f32 %v2542_v35, %v2543_v30  ;;  %v2635_v45 = vsel %vm2605_vm8, %v2634_v40, %v2633_v13  ;;  %v2606_v34 = vsel %vm2605_vm8, %v2604_v37, %v2603_v50 }
 0x23b   :  { %v2572_v16 = vmul.f32 %v4197_v12, %v2544_v43  ;;  %v2554_v3 = vmul.f32 %v4192_v9, %v2544_v43 }
 0x23d   :  { %v2580_v48 = vadd.f32 %v2572_v16, %v4156_v41  ;;  %v2562_v46 = vadd.f32 %v2554_v3, %v4158_v56 }
 0x23f   :  { %v2636_v11 = vrot.slane %v2580_v48, 1  ;;  %v2607_v38 = vrot.slane %v2562_v46, 1 }
 0x241   :  { %v2637_v24 = vsel %vm2608_vm9, %v2636_v11, %v2635_v45  ;;  %v2609_v36 = vsel %vm2608_vm9, %v2607_v38, %v2606_v34 }
 0x242   :  { %2639 = vadd.xlane.f32.xlu0 %v2637_v24 }
 0x24a   :  { %2611 = vadd.xlane.f32.xlu0 %v2609_v36 }
 0x2b5   :  { %v2640_v58 = vpop.xlane.xlu0 %2639 }
 0x2b6   :  { %v2641_v44 = vadd.f32 %v3721_v61, %v2640_v58 }
 0x2b8   :  { %2643 = vrot.lane.b32.xlu1 %v2641_v44, %s3757_s8 }
 0x2bd   :  { %v2612_v9 = vpop.xlane.xlu0 %2611 }
 0x2be   :  { %v2615_v12 = vadd.f32 %v3721_v61, %v2612_v9 }
 0x32a   :  { %v2644_v41 = vpop.permute.xlu1 %2643 }
 0x32b   :  { %v2646_v54 = vmax.f32 %v2615_v12, %v2644_v41 }
 0x32d   :  { %v2647_v56 = vsub.f32 %v2615_v12, %v2646_v54  ;;  %2651 = vrot.lane.b32.xlu1 %v2646_v54, %s3758_s9 }
 0x32f   :  { %v2648_v55 = vmul.f32 1.442695, %v2647_v56 }
 0x39f   :  { %v2652_v39 = vpop.permute.xlu1 %2651 }
 0x3a0   :  { %v2654_v59 = vsub.f32 %v2641_v44, %v2652_v39 }
 0x3a2   :  { %v2655_v20 = vmul.f32 1.442695, %v2654_v59 }
 0x3a4   :  { %3722 = vpow2.f32 %v2655_v20 }
 0x3a5   :  { %3724 = vpow2.f32 %v2648_v55 }
 0x3aa   :  { %v3723_v51 = vpop.eup %3722 }
 0x3ab   :  { %2658 = vrot.lane.b32.xlu2 %v3723_v51, %s3757_s8  ;;  %v3725_v60 = vpop.eup %3724 }
 0x405   :  { %v2659_v49 = vpop.permute.xlu2 %2658 }
 0x406   :  { %v2661_v62 = vadd.f32 %v3725_v60, %v2659_v49 }
 0x408   :  { %3726 = vrcp.f32 %v2661_v62  ;;  %v2673_v10 = vand.u32 2147483648, %v2661_v62  ;;  %v2671_v63 = vand.u32 2147483647, %v2661_v62  ;;  %vm2667_vm11 = vweird.f32 %v2661_v62 }
 0x40a   :  { %v2674_v5 = vor.u32 1.1754944e-38, %v2673_v10  ;;  %vm2672_vm13 = vcmp.eq.f32.partialorder %v2671_v63, 8.507059e+37 }
 0x40e   :  { %v3727_v7 = vpop.eup %3726 }
 0x40f   :  { %v2663_v31 = vmul.f32 %v3727_v7, %v2661_v62  ;;  %vm2668_vm10 = vweird.f32 %v3727_v7 }
 0x410   :  { %vm2669_vm12 = vmor %vm2667_vm11, %vm2668_vm10 }
 0x411   :  { %v2664_v0 = vsub.f32 1.0, %v2663_v31 }
 0x413   :  { %v2665_v22 = vmul.f32 %v3727_v7, %v2664_v0 }
 0x415   :  { %v2666_v6 = vadd.f32 %v3727_v7, %v2665_v22 }
 0x417   :  { %v2670_v19 = vsel %vm2669_vm12, %v3727_v7, %v2666_v6 }
 0x418   :  { %v2675_v17 = vsel %vm2672_vm13, %v2674_v5, %v2670_v19 }
 0x419   :  { %2683 = vrot.lane.b32.xlu2 %v2675_v17, %s3758_s9  ;;  %v2680_v25 = vmul.f32 %v3725_v60, %v2675_v17 }
 0x41b   :  { %2695 = vperm.xlu1 %3713, %v2680_v25  }
 0x473   :  { %v2684_v47 = vpop.permute.xlu2 %2683 }
 0x474   :  { %v2686_v57 = vmul.f32 %v3723_v51, %v2684_v47 }
 0x476   :  { %2689 = vperm.xlu0 %3712, %v2686_v57  }
 0x47e   :  { %3714 = vset.pattern.permute.xlu0 %v3759_v42 }
 0x48d   :  { %v2696_v52 = vpop.permute.xlu1 %2695 }
 0x4e8   :  { %v2690_v15 = vpop.permute.xlu0 %2689 }
 0x4e9   :  { %v2692_v32 = vsel %vm2681_vm14, %v2690_v15, 0.0 }
 0x4ea   :  { %v2698_v33 = vsel %vm2679_vm15, %v2696_v52, %v2692_v32 }
 0x4eb   :  { %2699 = vst [vmem:[%s4256_s3] sm:$0xff] %v2698_v33 }
 0x4ec   :  { %2704 = vsyncpa [#allocation3], 1 }

</bundles_post_ra>
